<compile_context>
chip_gen: v5e
topology: v5e:2x2
jax: 0.10.0
libtpu: 0.0.40
codegen_flags: <defaults>
</compile_context>

<pallas_src>
import functools

import jax
import jax.numpy as jnp
from jax.experimental import pallas as pl


# ----------------------------------------------------------------------------
# Fused Pallas kernel: RGCN layers + head/tail gather + output MLP head.
# ----------------------------------------------------------------------------
def _text_rgcn_fused_kernel(*refs, num_layers, num_relations, num_nodes):
    """refs = (gh, gt, a_stack, x,
               [w_rel_l, w_root_l, bias_l] * num_layers,
               w1_head, w1_tail, b1, w2_t, b2, out)

    gh, gt     : (B, N)       bf16 one-hot gather matrices (head / tail rows)
    a_stack    : (R*N, N)     bf16 row-stacked, row-normalized relation adj.
    x          : (N, D0)      bf16 node features
    w_rel_l    : (R, D_l, H)  bf16
    w_root_l   : (D_l, H)     bf16
    bias_l     : (1, H)       f32
    w1_head/t  : (H, 2H)      bf16 (row halves of the (2H, 2H) output Linear)
    b1         : (1, 2H)      f32
    w2_t       : (1, 2H)      bf16 (transposed (2H, 1) Linear weight)
    b2         : (1, 1)       f32
    out        : (B, 1)       f32
    """
    R, N = num_relations, num_nodes
    gh_ref, gt_ref, a_ref, x_ref = refs[0:4]
    layer_refs = refs[4:4 + 3 * num_layers]
    w1h_ref, w1t_ref, b1_ref, w2t_ref, b2_ref = refs[4 + 3 * num_layers:
                                                     9 + 3 * num_layers]
    o_ref = refs[9 + 3 * num_layers]

    a = a_ref[...]                                    # (R*N, N) bf16, resident
    h = x_ref[...]                                    # (N, D)   bf16

    for l in range(num_layers):
        w_rel_ref = layer_refs[3 * l]
        w_root_ref = layer_refs[3 * l + 1]
        b_ref = layer_refs[3 * l + 2]
        # Accumulator starts at the root/self term + bias.
        out = jnp.dot(h, w_root_ref[...],
                      preferred_element_type=jnp.float32) + b_ref[...]
        # Mean aggregation for ALL relations in one MXU matmul.
        agg = jnp.dot(a, h, preferred_element_type=jnp.float32)    # (R*N, D)
        agg = agg.astype(jnp.bfloat16)
        # Per-relation weight contraction, unrolled (each dot has K = D >= 128).
        for r in range(R):
            out = out + jnp.dot(agg[r * N:(r + 1) * N, :], w_rel_ref[r],
                                preferred_element_type=jnp.float32)
        if l < num_layers - 1:                        # last conv has no ReLU
            out = jnp.maximum(out, 0.0)
        h = out.astype(jnp.bfloat16)

    # Gather head/tail rows with one-hot matmuls; enc = cat([head, tail], -1).
    head = jnp.dot(gh_ref[...], h,
                   preferred_element_type=jnp.float32).astype(jnp.bfloat16)
    tail = jnp.dot(gt_ref[...], h,
                   preferred_element_type=jnp.float32).astype(jnp.bfloat16)
    # enc @ W1 == head @ W1[:H] + tail @ W1[H:]
    hid = (jnp.dot(head, w1h_ref[...], preferred_element_type=jnp.float32)
           + jnp.dot(tail, w1t_ref[...], preferred_element_type=jnp.float32)
           + b1_ref[...])
    hid = jnp.maximum(hid, 0.0)                       # (B, 2H) f32
    # Final (., 1) projection as VPU multiply + lane reduction (avoids a
    # 1-lane-wide MXU operand).
    w2 = w2t_ref[...].astype(jnp.float32)             # (1, 2H)
    out = jnp.sum(hid * w2, axis=-1, keepdims=True) + b2_ref[...]
    o_ref[...] = out.astype(o_ref.dtype)


def text_rgcn_forward(params, x, rel_adj, head_idx, tail_idx):
    """TextRGCN.forward for the GNN_only configuration (eval mode)."""
    R, N, _ = rel_adj.shape
    num_layers = len(params["convs"])
    hidden = params["convs"][-1]["w_root"].shape[1]
    B = head_idx.shape[0]

    # TODO(synk): at realistic N the dense (R, N, N) adjacency should be
    # streamed per node-tile (pl.Buffered / bigger vmem_limit_bytes on v7x's
    # 64 MiB VMEM) or replaced by a CSR/segment-sum gather, and a "parallel"
    # node-tile grid axis added so v7x's 2 TensorCores both work; at this size
    # everything (< 1.5 MiB) is simply kept resident in VMEM.
    a_stack = rel_adj.reshape(R * N, N).astype(jnp.bfloat16)
    gh = jax.nn.one_hot(head_idx, N, dtype=jnp.bfloat16)       # (B, N)
    gt = jax.nn.one_hot(tail_idx, N, dtype=jnp.bfloat16)

    args = [gh, gt, a_stack, x.astype(jnp.bfloat16)]
    for p in params["convs"]:
        args += [p["w_rel"].astype(jnp.bfloat16),
                 p["w_root"].astype(jnp.bfloat16),
                 p["bias"].astype(jnp.float32)]
    w1 = params["out_w1"]                                      # (2H, 2H)
    args += [w1[:hidden].astype(jnp.bfloat16),                 # head rows
             w1[hidden:].astype(jnp.bfloat16),                 # tail rows
             params["out_b1"].astype(jnp.float32),
             params["out_w2"].T.astype(jnp.bfloat16),          # (1, 2H)
             params["out_b2"].astype(jnp.float32)]

    kernel = functools.partial(_text_rgcn_fused_kernel,
                               num_layers=num_layers,
                               num_relations=R, num_nodes=N)
    # Single launch, no grid: all operands are whole-array resident VMEM
    # blocks, so there are no per-relation grid steps and no inter-layer HBM
    # round trips.
    return pl.pallas_call(
        kernel,
        out_shape=jax.ShapeDtypeStruct((B, 1), jnp.float32),
    )(*args)


# ----------------------------------------------------------------------------
# Glue (plain JAX / Python): graph preprocessing & parameter setup
# ----------------------------------------------------------------------------
def build_rel_adj(edge_index, edge_type, num_nodes, num_relations):
    """Dense per-relation row-normalized adjacency (mean aggregation, src->dst)."""
    src, dst = edge_index[0], edge_index[1]
    A = jnp.zeros((num_relations, num_nodes, num_nodes), jnp.float32)
    A = A.at[edge_type, dst, src].add(1.0)
    deg = A.sum(axis=-1, keepdims=True)
    return A / jnp.where(deg > 0, deg, 1.0)


def offset_inds(inds_local, batch):
    """Reproduce the cumulative per-graph node-count offsetting of the inds."""
    batch = list(batch)
    heads, tails = list(inds_local[0]), list(inds_local[1])
    for i in range(1, len(heads)):
        v_c = 0
        for j in range(i, 0, -1):
            v_c += batch.count(j - 1)
        heads[i] += v_c
        tails[i] += v_c
    return jnp.array(heads, jnp.int32), jnp.array(tails, jnp.int32)


def init_params(key, input_dim, hidden, num_relations, num_layers):
    dims = [input_dim] + [hidden] * (num_layers - 1) + [hidden]
    params = {"convs": []}
    for li in range(num_layers):
        d_in, d_out = dims[li], dims[li + 1]
        key, k1, k2, k3 = jax.random.split(key, 4)
        scale = 1.0 / jnp.sqrt(jnp.float32(d_in))
        params["convs"].append({
            "w_rel": jax.random.normal(k1, (num_relations, d_in, d_out),
                                       jnp.float32) * scale,
            "w_root": jax.random.normal(k2, (d_in, d_out), jnp.float32) * scale,
            "bias": jax.random.normal(k3, (1, d_out), jnp.float32) * 0.01,
        })
    key, k1, k2, k3, k4 = jax.random.split(key, 5)
    gnn_out = 2 * hidden  # not unidirectional -> cat([head, tail])
    s = 1.0 / jnp.sqrt(jnp.float32(gnn_out))
    params["out_w1"] = jax.random.normal(k1, (gnn_out, gnn_out), jnp.float32) * s
    params["out_b1"] = jax.random.normal(k2, (1, gnn_out), jnp.float32) * 0.01
    params["out_w2"] = jax.random.normal(k3, (gnn_out, 1), jnp.float32) * s
    params["out_b2"] = jax.random.normal(k4, (1, 1), jnp.float32) * 0.01
    return params


# ----------------------------------------------------------------------------
# Pure-JAX references
# ----------------------------------------------------------------------------
def reference_forward_bf16(params, x, rel_adj, head_idx, tail_idx):
    """Reference mirroring the kernel's precision exactly (bf16 operands,
    f32 accumulation) -- isolates the Pallas implementation for the check."""
    L = len(params["convs"])
    a = rel_adj.astype(jnp.bfloat16)
    h = x.astype(jnp.bfloat16)
    for li, p in enumerate(params["convs"]):
        w_rel = p["w_rel"].astype(jnp.bfloat16)
        w_root = p["w_root"].astype(jnp.bfloat16)
        out = jnp.dot(h, w_root, preferred_element_type=jnp.float32) + p["bias"]
        agg = jnp.einsum("rnm,md->rnd", a, h,
                         preferred_element_type=jnp.float32).astype(jnp.bfloat16)
        out = out + jnp.einsum("rnd,rdo->no", agg, w_rel,
                               preferred_element_type=jnp.float32)
        if li < L - 1:
            out = jnp.maximum(out, 0.0)
        h = out.astype(jnp.bfloat16)
    enc = jnp.concatenate([h[head_idx], h[tail_idx]], axis=-1)     # (B, 2H)
    w1 = params["out_w1"].astype(jnp.bfloat16)
    hid = jnp.maximum(jnp.dot(enc, w1, preferred_element_type=jnp.float32)
                      + params["out_b1"], 0.0)
    w2 = params["out_w2"].astype(jnp.bfloat16).astype(jnp.float32).reshape(1, -1)
    return jnp.sum(hid * w2, axis=-1, keepdims=True) + params["out_b2"]


def reference_forward_f32(params, x, rel_adj, head_idx, tail_idx):
    """Full-precision reference of the original module math (loose check)."""
    L = len(params["convs"])
    h = x
    for li, p in enumerate(params["convs"]):
        agg = jnp.einsum("rnm,md->rnd", rel_adj, h)
        out = (jnp.einsum("rnd,rdo->no", agg, p["w_rel"])
               + h @ p["w_root"] + p["bias"])
        h = jnp.maximum(out, 0.0) if li < L - 1 else out
    enc = jnp.concatenate([h[head_idx], h[tail_idx]], axis=-1)
    hid = jnp.maximum(enc @ params["out_w1"] + params["out_b1"], 0.0)
    return hid @ params["out_w2"] + params["out_b2"]


# ----------------------------------------------------------------------------
if __name__ == "__main__":
    # Small, deterministic synthetic problem.
    NUM_NODES = 16          # 2 graphs x 8 nodes
    GRAPH_INPUT_DIM = 128   # stands in for 768
    HIDDEN = 128            # args.gnn_hidden
    NUM_RELATIONS = 10      # not unidirectional / not bidirectional
    NUM_LAYERS = 3          # args.gnn_layers
    NUM_EDGES = 40

    key = jax.random.PRNGKey(0)
    key, kx, ks, kd, kt = jax.random.split(key, 5)

    x = jax.random.normal(kx, (NUM_NODES, GRAPH_INPUT_DIM), jnp.float32)
    # Keep edges inside each graph (nodes 0..7 | 8..15).
    src0 = jax.random.randint(ks, (NUM_EDGES // 2,), 0, 8)
    dst0 = jax.random.randint(kd, (NUM_EDGES // 2,), 0, 8)
    edge_index = jnp.stack([
        jnp.concatenate([src0, src0 + 8]),
        jnp.concatenate([dst0, dst0 + 8]),
    ])                                                     # [2, E]
    edge_type = jax.random.randint(kt, (NUM_EDGES,), 0, NUM_RELATIONS)
    batch = [0] * 8 + [1] * 8                              # data.batch
    inds_local = ([1, 2], [3, 5])                          # (heads, tails), graph-local

    rel_adj = build_rel_adj(edge_index, edge_type, NUM_NODES, NUM_RELATIONS)
    head_idx, tail_idx = offset_inds(inds_local, batch)

    params = init_params(jax.random.PRNGKey(42), GRAPH_INPUT_DIM, HIDDEN,
                         NUM_RELATIONS, NUM_LAYERS)

    out = text_rgcn_forward(params, x, rel_adj, head_idx, tail_idx)
    out = jax.block_until_ready(out)
    assert out.shape == (2, 1), out.shape

    ref_bf16 = reference_forward_bf16(params, x, rel_adj, head_idx, tail_idx)
    assert jnp.allclose(out, ref_bf16, rtol=1e-2, atol=1e-2), (out, ref_bf16)

    ref_f32 = reference_forward_f32(params, x, rel_adj, head_idx, tail_idx)
    assert jnp.allclose(out, ref_f32, rtol=1e-1, atol=1e-1), (out, ref_f32)

    # TODO(synk): BERT text-encoder branches (LM_only / unidirectional /
    # bidirectional) have no clean in-script Pallas equivalent; only the
    # GNN_only path is implemented.
    print("KERNEL_OK")
</pallas_src>

<mosaic_0001>
module attributes {stable_mosaic.version = 11 : i64} {
  func.func @_text_rgcn_fused_kernel(%arg0: memref<2x16xbf16, #tpu.memory_space<vmem>>, %arg1: memref<2x16xbf16, #tpu.memory_space<vmem>>, %arg2: memref<160x16xbf16, #tpu.memory_space<vmem>>, %arg3: memref<16x128xbf16, #tpu.memory_space<vmem>>, %arg4: memref<10x128x128xbf16, #tpu.memory_space<vmem>>, %arg5: memref<128x128xbf16, #tpu.memory_space<vmem>>, %arg6: memref<1x128xf32, #tpu.memory_space<vmem>>, %arg7: memref<10x128x128xbf16, #tpu.memory_space<vmem>>, %arg8: memref<128x128xbf16, #tpu.memory_space<vmem>>, %arg9: memref<1x128xf32, #tpu.memory_space<vmem>>, %arg10: memref<10x128x128xbf16, #tpu.memory_space<vmem>>, %arg11: memref<128x128xbf16, #tpu.memory_space<vmem>>, %arg12: memref<1x128xf32, #tpu.memory_space<vmem>>, %arg13: memref<128x256xbf16, #tpu.memory_space<vmem>>, %arg14: memref<128x256xbf16, #tpu.memory_space<vmem>>, %arg15: memref<1x256xf32, #tpu.memory_space<vmem>>, %arg16: memref<1x256xbf16, #tpu.memory_space<vmem>>, %arg17: memref<1x1xf32, #tpu.memory_space<vmem>>, %arg18: memref<2x1xf32, #tpu.memory_space<vmem>>) attributes {dimension_semantics = [], scalar_prefetch = 0 : i64, scratch_operands = 0 : i64, tpu.core_type = #tpu.core_type<tc>} {
    %c0 = arith.constant 0 : index
    %c0_0 = arith.constant 0 : index
    %0 = vector.load %arg2[%c0, %c0_0] : memref<160x16xbf16, #tpu.memory_space<vmem>>, vector<160x16xbf16>
    %c0_1 = arith.constant 0 : index
    %c0_2 = arith.constant 0 : index
    %1 = vector.load %arg3[%c0_1, %c0_2] : memref<16x128xbf16, #tpu.memory_space<vmem>>, vector<16x128xbf16>
    %c0_3 = arith.constant 0 : index
    %c0_4 = arith.constant 0 : index
    %2 = vector.load %arg5[%c0_3, %c0_4] : memref<128x128xbf16, #tpu.memory_space<vmem>>, vector<128x128xbf16>
    %cst = arith.constant dense<0.000000e+00> : vector<16x128xf32>
    %3 = tpu.matmul %1, %2, %cst {dimension_numbers = #tpu.dot_dimension_numbers<[1], [0], [0], [1], [0, 0, 1, 1], [], []>} : vector<16x128xbf16>, vector<128x128xbf16>, vector<16x128xf32> -> vector<16x128xf32>
    %c0_5 = arith.constant 0 : index
    %c0_6 = arith.constant 0 : index
    %4 = vector.load %arg6[%c0_5, %c0_6] : memref<1x128xf32, #tpu.memory_space<vmem>>, vector<1x128xf32>
    %5 = vector.broadcast %4 : vector<1x128xf32> to vector<16x128xf32>
    %6 = arith.addf %3, %5 : vector<16x128xf32>
    %cst_7 = arith.constant dense<0.000000e+00> : vector<160x128xf32>
    %7 = tpu.matmul %0, %1, %cst_7 {dimension_numbers = #tpu.dot_dimension_numbers<[1], [0], [0], [1], [0, 0, 1, 1], [], []>} : vector<160x16xbf16>, vector<16x128xbf16>, vector<160x128xf32> -> vector<160x128xf32>
    %8 = arith.truncf %7 : vector<160x128xf32> to vector<160x128xbf16>
    %9 = vector.extract_strided_slice %8 {offsets = [0, 0], sizes = [16, 128], strides = [1, 1]} : vector<160x128xbf16> to vector<16x128xbf16>
    %c0_8 = arith.constant 0 : index
    %c0_9 = arith.constant 0 : index
    %c0_10 = arith.constant 0 : index
    %10 = vector.load %arg4[%c0_8, %c0_9, %c0_10] : memref<10x128x128xbf16, #tpu.memory_space<vmem>>, vector<1x128x128xbf16>
    %11 = vector.shape_cast %10 : vector<1x128x128xbf16> to vector<128x128xbf16>
    %cst_11 = arith.constant dense<0.000000e+00> : vector<16x128xf32>
    %12 = tpu.matmul %9, %11, %cst_11 {dimension_numbers = #tpu.dot_dimension_numbers<[1], [0], [0], [1], [0, 0, 1, 1], [], []>} : vector<16x128xbf16>, vector<128x128xbf16>, vector<16x128xf32> -> vector<16x128xf32>
    %13 = arith.addf %6, %12 : vector<16x128xf32>
    %14 = vector.extract_strided_slice %8 {offsets = [16, 0], sizes = [16, 128], strides = [1, 1]} : vector<160x128xbf16> to vector<16x128xbf16>
    %c1 = arith.constant 1 : index
    %c0_12 = arith.constant 0 : index
    %c0_13 = arith.constant 0 : index
    %15 = vector.load %arg4[%c1, %c0_12, %c0_13] : memref<10x128x128xbf16, #tpu.memory_space<vmem>>, vector<1x128x128xbf16>
    %16 = vector.shape_cast %15 : vector<1x128x128xbf16> to vector<128x128xbf16>
    %cst_14 = arith.constant dense<0.000000e+00> : vector<16x128xf32>
    %17 = tpu.matmul %14, %16, %cst_14 {dimension_numbers = #tpu.dot_dimension_numbers<[1], [0], [0], [1], [0, 0, 1, 1], [], []>} : vector<16x128xbf16>, vector<128x128xbf16>, vector<16x128xf32> -> vector<16x128xf32>
    %18 = arith.addf %13, %17 : vector<16x128xf32>
    %19 = vector.extract_strided_slice %8 {offsets = [32, 0], sizes = [16, 128], strides = [1, 1]} : vector<160x128xbf16> to vector<16x128xbf16>
    %c2 = arith.constant 2 : index
    %c0_15 = arith.constant 0 : index
    %c0_16 = arith.constant 0 : index
    %20 = vector.load %arg4[%c2, %c0_15, %c0_16] : memref<10x128x128xbf16, #tpu.memory_space<vmem>>, vector<1x128x128xbf16>
    %21 = vector.shape_cast %20 : vector<1x128x128xbf16> to vector<128x128xbf16>
    %cst_17 = arith.constant dense<0.000000e+00> : vector<16x128xf32>
    %22 = tpu.matmul %19, %21, %cst_17 {dimension_numbers = #tpu.dot_dimension_numbers<[1], [0], [0], [1], [0, 0, 1, 1], [], []>} : vector<16x128xbf16>, vector<128x128xbf16>, vector<16x128xf32> -> vector<16x128xf32>
    %23 = arith.addf %18, %22 : vector<16x128xf32>
    %24 = vector.extract_strided_slice %8 {offsets = [48, 0], sizes = [16, 128], strides = [1, 1]} : vector<160x128xbf16> to vector<16x128xbf16>
    %c3 = arith.constant 3 : index
    %c0_18 = arith.constant 0 : index
    %c0_19 = arith.constant 0 : index
    %25 = vector.load %arg4[%c3, %c0_18, %c0_19] : memref<10x128x128xbf16, #tpu.memory_space<vmem>>, vector<1x128x128xbf16>
    %26 = vector.shape_cast %25 : vector<1x128x128xbf16> to vector<128x128xbf16>
    %cst_20 = arith.constant dense<0.000000e+00> : vector<16x128xf32>
    %27 = tpu.matmul %24, %26, %cst_20 {dimension_numbers = #tpu.dot_dimension_numbers<[1], [0], [0], [1], [0, 0, 1, 1], [], []>} : vector<16x128xbf16>, vector<128x128xbf16>, vector<16x128xf32> -> vector<16x128xf32>
    %28 = arith.addf %23, %27 : vector<16x128xf32>
    %29 = vector.extract_strided_slice %8 {offsets = [64, 0], sizes = [16, 128], strides = [1, 1]} : vector<160x128xbf16> to vector<16x128xbf16>
    %c4 = arith.constant 4 : index
    %c0_21 = arith.constant 0 : index
    %c0_22 = arith.constant 0 : index
    %30 = vector.load %arg4[%c4, %c0_21, %c0_22] : memref<10x128x128xbf16, #tpu.memory_space<vmem>>, vector<1x128x128xbf16>
    %31 = vector.shape_cast %30 : vector<1x128x128xbf16> to vector<128x128xbf16>
    %cst_23 = arith.constant dense<0.000000e+00> : vector<16x128xf32>
    %32 = tpu.matmul %29, %31, %cst_23 {dimension_numbers = #tpu.dot_dimension_numbers<[1], [0], [0], [1], [0, 0, 1, 1], [], []>} : vector<16x128xbf16>, vector<128x128xbf16>, vector<16x128xf32> -> vector<16x128xf32>
    %33 = arith.addf %28, %32 : vector<16x128xf32>
    %34 = vector.extract_strided_slice %8 {offsets = [80, 0], sizes = [16, 128], strides = [1, 1]} : vector<160x128xbf16> to vector<16x128xbf16>
    %c5 = arith.constant 5 : index
    %c0_24 = arith.constant 0 : index
    %c0_25 = arith.constant 0 : index
    %35 = vector.load %arg4[%c5, %c0_24, %c0_25] : memref<10x128x128xbf16, #tpu.memory_space<vmem>>, vector<1x128x128xbf16>
    %36 = vector.shape_cast %35 : vector<1x128x128xbf16> to vector<128x128xbf16>
    %cst_26 = arith.constant dense<0.000000e+00> : vector<16x128xf32>
    %37 = tpu.matmul %34, %36, %cst_26 {dimension_numbers = #tpu.dot_dimension_numbers<[1], [0], [0], [1], [0, 0, 1, 1], [], []>} : vector<16x128xbf16>, vector<128x128xbf16>, vector<16x128xf32> -> vector<16x128xf32>
    %38 = arith.addf %33, %37 : vector<16x128xf32>
    %39 = vector.extract_strided_slice %8 {offsets = [96, 0], sizes = [16, 128], strides = [1, 1]} : vector<160x128xbf16> to vector<16x128xbf16>
    %c6 = arith.constant 6 : index
    %c0_27 = arith.constant 0 : index
    %c0_28 = arith.constant 0 : index
    %40 = vector.load %arg4[%c6, %c0_27, %c0_28] : memref<10x128x128xbf16, #tpu.memory_space<vmem>>, vector<1x128x128xbf16>
    %41 = vector.shape_cast %40 : vector<1x128x128xbf16> to vector<128x128xbf16>
    %cst_29 = arith.constant dense<0.000000e+00> : vector<16x128xf32>
    %42 = tpu.matmul %39, %41, %cst_29 {dimension_numbers = #tpu.dot_dimension_numbers<[1], [0], [0], [1], [0, 0, 1, 1], [], []>} : vector<16x128xbf16>, vector<128x128xbf16>, vector<16x128xf32> -> vector<16x128xf32>
    %43 = arith.addf %38, %42 : vector<16x128xf32>
    %44 = vector.extract_strided_slice %8 {offsets = [112, 0], sizes = [16, 128], strides = [1, 1]} : vector<160x128xbf16> to vector<16x128xbf16>
    %c7 = arith.constant 7 : index
    %c0_30 = arith.constant 0 : index
    %c0_31 = arith.constant 0 : index
    %45 = vector.load %arg4[%c7, %c0_30, %c0_31] : memref<10x128x128xbf16, #tpu.memory_space<vmem>>, vector<1x128x128xbf16>
    %46 = vector.shape_cast %45 : vector<1x128x128xbf16> to vector<128x128xbf16>
    %cst_32 = arith.constant dense<0.000000e+00> : vector<16x128xf32>
    %47 = tpu.matmul %44, %46, %cst_32 {dimension_numbers = #tpu.dot_dimension_numbers<[1], [0], [0], [1], [0, 0, 1, 1], [], []>} : vector<16x128xbf16>, vector<128x128xbf16>, vector<16x128xf32> -> vector<16x128xf32>
    %48 = arith.addf %43, %47 : vector<16x128xf32>
    %49 = vector.extract_strided_slice %8 {offsets = [128, 0], sizes = [16, 128], strides = [1, 1]} : vector<160x128xbf16> to vector<16x128xbf16>
    %c8 = arith.constant 8 : index
    %c0_33 = arith.constant 0 : index
    %c0_34 = arith.constant 0 : index
    %50 = vector.load %arg4[%c8, %c0_33, %c0_34] : memref<10x128x128xbf16, #tpu.memory_space<vmem>>, vector<1x128x128xbf16>
    %51 = vector.shape_cast %50 : vector<1x128x128xbf16> to vector<128x128xbf16>
    %cst_35 = arith.constant dense<0.000000e+00> : vector<16x128xf32>
    %52 = tpu.matmul %49, %51, %cst_35 {dimension_numbers = #tpu.dot_dimension_numbers<[1], [0], [0], [1], [0, 0, 1, 1], [], []>} : vector<16x128xbf16>, vector<128x128xbf16>, vector<16x128xf32> -> vector<16x128xf32>
    %53 = arith.addf %48, %52 : vector<16x128xf32>
    %54 = vector.extract_strided_slice %8 {offsets = [144, 0], sizes = [16, 128], strides = [1, 1]} : vector<160x128xbf16> to vector<16x128xbf16>
    %c9 = arith.constant 9 : index
    %c0_36 = arith.constant 0 : index
    %c0_37 = arith.constant 0 : index
    %55 = vector.load %arg4[%c9, %c0_36, %c0_37] : memref<10x128x128xbf16, #tpu.memory_space<vmem>>, vector<1x128x128xbf16>
    %56 = vector.shape_cast %55 : vector<1x128x128xbf16> to vector<128x128xbf16>
    %cst_38 = arith.constant dense<0.000000e+00> : vector<16x128xf32>
    %57 = tpu.matmul %54, %56, %cst_38 {dimension_numbers = #tpu.dot_dimension_numbers<[1], [0], [0], [1], [0, 0, 1, 1], [], []>} : vector<16x128xbf16>, vector<128x128xbf16>, vector<16x128xf32> -> vector<16x128xf32>
    %58 = arith.addf %53, %57 : vector<16x128xf32>
    %cst_39 = arith.constant 0.000000e+00 : f32
    %59 = vector.broadcast %cst_39 : f32 to vector<16x128xf32>
    %60 = arith.maximumf %58, %59 : vector<16x128xf32>
    %61 = arith.truncf %60 : vector<16x128xf32> to vector<16x128xbf16>
    %c0_40 = arith.constant 0 : index
    %c0_41 = arith.constant 0 : index
    %62 = vector.load %arg8[%c0_40, %c0_41] : memref<128x128xbf16, #tpu.memory_space<vmem>>, vector<128x128xbf16>
    %cst_42 = arith.constant dense<0.000000e+00> : vector<16x128xf32>
    %63 = tpu.matmul %61, %62, %cst_42 {dimension_numbers = #tpu.dot_dimension_numbers<[1], [0], [0], [1], [0, 0, 1, 1], [], []>} : vector<16x128xbf16>, vector<128x128xbf16>, vector<16x128xf32> -> vector<16x128xf32>
    %c0_43 = arith.constant 0 : index
    %c0_44 = arith.constant 0 : index
    %64 = vector.load %arg9[%c0_43, %c0_44] : memref<1x128xf32, #tpu.memory_space<vmem>>, vector<1x128xf32>
    %65 = vector.broadcast %64 : vector<1x128xf32> to vector<16x128xf32>
    %66 = arith.addf %63, %65 : vector<16x128xf32>
    %cst_45 = arith.constant dense<0.000000e+00> : vector<160x128xf32>
    %67 = tpu.matmul %0, %61, %cst_45 {dimension_numbers = #tpu.dot_dimension_numbers<[1], [0], [0], [1], [0, 0, 1, 1], [], []>} : vector<160x16xbf16>, vector<16x128xbf16>, vector<160x128xf32> -> vector<160x128xf32>
    %68 = arith.truncf %67 : vector<160x128xf32> to vector<160x128xbf16>
    %69 = vector.extract_strided_slice %68 {offsets = [0, 0], sizes = [16, 128], strides = [1, 1]} : vector<160x128xbf16> to vector<16x128xbf16>
    %c0_46 = arith.constant 0 : index
    %c0_47 = arith.constant 0 : index
    %c0_48 = arith.constant 0 : index
    %70 = vector.load %arg7[%c0_46, %c0_47, %c0_48] : memref<10x128x128xbf16, #tpu.memory_space<vmem>>, vector<1x128x128xbf16>
    %71 = vector.shape_cast %70 : vector<1x128x128xbf16> to vector<128x128xbf16>
    %cst_49 = arith.constant dense<0.000000e+00> : vector<16x128xf32>
    %72 = tpu.matmul %69, %71, %cst_49 {dimension_numbers = #tpu.dot_dimension_numbers<[1], [0], [0], [1], [0, 0, 1, 1], [], []>} : vector<16x128xbf16>, vector<128x128xbf16>, vector<16x128xf32> -> vector<16x128xf32>
    %73 = arith.addf %66, %72 : vector<16x128xf32>
    %74 = vector.extract_strided_slice %68 {offsets = [16, 0], sizes = [16, 128], strides = [1, 1]} : vector<160x128xbf16> to vector<16x128xbf16>
    %c1_50 = arith.constant 1 : index
    %c0_51 = arith.constant 0 : index
    %c0_52 = arith.constant 0 : index
    %75 = vector.load %arg7[%c1_50, %c0_51, %c0_52] : memref<10x128x128xbf16, #tpu.memory_space<vmem>>, vector<1x128x128xbf16>
    %76 = vector.shape_cast %75 : vector<1x128x128xbf16> to vector<128x128xbf16>
    %cst_53 = arith.constant dense<0.000000e+00> : vector<16x128xf32>
    %77 = tpu.matmul %74, %76, %cst_53 {dimension_numbers = #tpu.dot_dimension_numbers<[1], [0], [0], [1], [0, 0, 1, 1], [], []>} : vector<16x128xbf16>, vector<128x128xbf16>, vector<16x128xf32> -> vector<16x128xf32>
    %78 = arith.addf %73, %77 : vector<16x128xf32>
    %79 = vector.extract_strided_slice %68 {offsets = [32, 0], sizes = [16, 128], strides = [1, 1]} : vector<160x128xbf16> to vector<16x128xbf16>
    %c2_54 = arith.constant 2 : index
    %c0_55 = arith.constant 0 : index
    %c0_56 = arith.constant 0 : index
    %80 = vector.load %arg7[%c2_54, %c0_55, %c0_56] : memref<10x128x128xbf16, #tpu.memory_space<vmem>>, vector<1x128x128xbf16>
    %81 = vector.shape_cast %80 : vector<1x128x128xbf16> to vector<128x128xbf16>
    %cst_57 = arith.constant dense<0.000000e+00> : vector<16x128xf32>
    %82 = tpu.matmul %79, %81, %cst_57 {dimension_numbers = #tpu.dot_dimension_numbers<[1], [0], [0], [1], [0, 0, 1, 1], [], []>} : vector<16x128xbf16>, vector<128x128xbf16>, vector<16x128xf32> -> vector<16x128xf32>
    %83 = arith.addf %78, %82 : vector<16x128xf32>
    %84 = vector.extract_strided_slice %68 {offsets = [48, 0], sizes = [16, 128], strides = [1, 1]} : vector<160x128xbf16> to vector<16x128xbf16>
    %c3_58 = arith.constant 3 : index
    %c0_59 = arith.constant 0 : index
    %c0_60 = arith.constant 0 : index
    %85 = vector.load %arg7[%c3_58, %c0_59, %c0_60] : memref<10x128x128xbf16, #tpu.memory_space<vmem>>, vector<1x128x128xbf16>
    %86 = vector.shape_cast %85 : vector<1x128x128xbf16> to vector<128x128xbf16>
    %cst_61 = arith.constant dense<0.000000e+00> : vector<16x128xf32>
    %87 = tpu.matmul %84, %86, %cst_61 {dimension_numbers = #tpu.dot_dimension_numbers<[1], [0], [0], [1], [0, 0, 1, 1], [], []>} : vector<16x128xbf16>, vector<128x128xbf16>, vector<16x128xf32> -> vector<16x128xf32>
    %88 = arith.addf %83, %87 : vector<16x128xf32>
    %89 = vector.extract_strided_slice %68 {offsets = [64, 0], sizes = [16, 128], strides = [1, 1]} : vector<160x128xbf16> to vector<16x128xbf16>
    %c4_62 = arith.constant 4 : index
    %c0_63 = arith.constant 0 : index
    %c0_64 = arith.constant 0 : index
    %90 = vector.load %arg7[%c4_62, %c0_63, %c0_64] : memref<10x128x128xbf16, #tpu.memory_space<vmem>>, vector<1x128x128xbf16>
    %91 = vector.shape_cast %90 : vector<1x128x128xbf16> to vector<128x128xbf16>
    %cst_65 = arith.constant dense<0.000000e+00> : vector<16x128xf32>
    %92 = tpu.matmul %89, %91, %cst_65 {dimension_numbers = #tpu.dot_dimension_numbers<[1], [0], [0], [1], [0, 0, 1, 1], [], []>} : vector<16x128xbf16>, vector<128x128xbf16>, vector<16x128xf32> -> vector<16x128xf32>
    %93 = arith.addf %88, %92 : vector<16x128xf32>
    %94 = vector.extract_strided_slice %68 {offsets = [80, 0], sizes = [16, 128], strides = [1, 1]} : vector<160x128xbf16> to vector<16x128xbf16>
    %c5_66 = arith.constant 5 : index
    %c0_67 = arith.constant 0 : index
    %c0_68 = arith.constant 0 : index
    %95 = vector.load %arg7[%c5_66, %c0_67, %c0_68] : memref<10x128x128xbf16, #tpu.memory_space<vmem>>, vector<1x128x128xbf16>
    %96 = vector.shape_cast %95 : vector<1x128x128xbf16> to vector<128x128xbf16>
    %cst_69 = arith.constant dense<0.000000e+00> : vector<16x128xf32>
    %97 = tpu.matmul %94, %96, %cst_69 {dimension_numbers = #tpu.dot_dimension_numbers<[1], [0], [0], [1], [0, 0, 1, 1], [], []>} : vector<16x128xbf16>, vector<128x128xbf16>, vector<16x128xf32> -> vector<16x128xf32>
    %98 = arith.addf %93, %97 : vector<16x128xf32>
    %99 = vector.extract_strided_slice %68 {offsets = [96, 0], sizes = [16, 128], strides = [1, 1]} : vector<160x128xbf16> to vector<16x128xbf16>
    %c6_70 = arith.constant 6 : index
    %c0_71 = arith.constant 0 : index
    %c0_72 = arith.constant 0 : index
    %100 = vector.load %arg7[%c6_70, %c0_71, %c0_72] : memref<10x128x128xbf16, #tpu.memory_space<vmem>>, vector<1x128x128xbf16>
    %101 = vector.shape_cast %100 : vector<1x128x128xbf16> to vector<128x128xbf16>
    %cst_73 = arith.constant dense<0.000000e+00> : vector<16x128xf32>
    %102 = tpu.matmul %99, %101, %cst_73 {dimension_numbers = #tpu.dot_dimension_numbers<[1], [0], [0], [1], [0, 0, 1, 1], [], []>} : vector<16x128xbf16>, vector<128x128xbf16>, vector<16x128xf32> -> vector<16x128xf32>
    %103 = arith.addf %98, %102 : vector<16x128xf32>
    %104 = vector.extract_strided_slice %68 {offsets = [112, 0], sizes = [16, 128], strides = [1, 1]} : vector<160x128xbf16> to vector<16x128xbf16>
    %c7_74 = arith.constant 7 : index
    %c0_75 = arith.constant 0 : index
    %c0_76 = arith.constant 0 : index
    %105 = vector.load %arg7[%c7_74, %c0_75, %c0_76] : memref<10x128x128xbf16, #tpu.memory_space<vmem>>, vector<1x128x128xbf16>
    %106 = vector.shape_cast %105 : vector<1x128x128xbf16> to vector<128x128xbf16>
    %cst_77 = arith.constant dense<0.000000e+00> : vector<16x128xf32>
    %107 = tpu.matmul %104, %106, %cst_77 {dimension_numbers = #tpu.dot_dimension_numbers<[1], [0], [0], [1], [0, 0, 1, 1], [], []>} : vector<16x128xbf16>, vector<128x128xbf16>, vector<16x128xf32> -> vector<16x128xf32>
    %108 = arith.addf %103, %107 : vector<16x128xf32>
    %109 = vector.extract_strided_slice %68 {offsets = [128, 0], sizes = [16, 128], strides = [1, 1]} : vector<160x128xbf16> to vector<16x128xbf16>
    %c8_78 = arith.constant 8 : index
    %c0_79 = arith.constant 0 : index
    %c0_80 = arith.constant 0 : index
    %110 = vector.load %arg7[%c8_78, %c0_79, %c0_80] : memref<10x128x128xbf16, #tpu.memory_space<vmem>>, vector<1x128x128xbf16>
    %111 = vector.shape_cast %110 : vector<1x128x128xbf16> to vector<128x128xbf16>
    %cst_81 = arith.constant dense<0.000000e+00> : vector<16x128xf32>
    %112 = tpu.matmul %109, %111, %cst_81 {dimension_numbers = #tpu.dot_dimension_numbers<[1], [0], [0], [1], [0, 0, 1, 1], [], []>} : vector<16x128xbf16>, vector<128x128xbf16>, vector<16x128xf32> -> vector<16x128xf32>
    %113 = arith.addf %108, %112 : vector<16x128xf32>
    %114 = vector.extract_strided_slice %68 {offsets = [144, 0], sizes = [16, 128], strides = [1, 1]} : vector<160x128xbf16> to vector<16x128xbf16>
    %c9_82 = arith.constant 9 : index
    %c0_83 = arith.constant 0 : index
    %c0_84 = arith.constant 0 : index
    %115 = vector.load %arg7[%c9_82, %c0_83, %c0_84] : memref<10x128x128xbf16, #tpu.memory_space<vmem>>, vector<1x128x128xbf16>
    %116 = vector.shape_cast %115 : vector<1x128x128xbf16> to vector<128x128xbf16>
    %cst_85 = arith.constant dense<0.000000e+00> : vector<16x128xf32>
    %117 = tpu.matmul %114, %116, %cst_85 {dimension_numbers = #tpu.dot_dimension_numbers<[1], [0], [0], [1], [0, 0, 1, 1], [], []>} : vector<16x128xbf16>, vector<128x128xbf16>, vector<16x128xf32> -> vector<16x128xf32>
    %118 = arith.addf %113, %117 : vector<16x128xf32>
    %cst_86 = arith.constant 0.000000e+00 : f32
    %119 = vector.broadcast %cst_86 : f32 to vector<16x128xf32>
    %120 = arith.maximumf %118, %119 : vector<16x128xf32>
    %121 = arith.truncf %120 : vector<16x128xf32> to vector<16x128xbf16>
    %c0_87 = arith.constant 0 : index
    %c0_88 = arith.constant 0 : index
    %122 = vector.load %arg11[%c0_87, %c0_88] : memref<128x128xbf16, #tpu.memory_space<vmem>>, vector<128x128xbf16>
    %cst_89 = arith.constant dense<0.000000e+00> : vector<16x128xf32>
    %123 = tpu.matmul %121, %122, %cst_89 {dimension_numbers = #tpu.dot_dimension_numbers<[1], [0], [0], [1], [0, 0, 1, 1], [], []>} : vector<16x128xbf16>, vector<128x128xbf16>, vector<16x128xf32> -> vector<16x128xf32>
    %c0_90 = arith.constant 0 : index
    %c0_91 = arith.constant 0 : index
    %124 = vector.load %arg12[%c0_90, %c0_91] : memref<1x128xf32, #tpu.memory_space<vmem>>, vector<1x128xf32>
    %125 = vector.broadcast %124 : vector<1x128xf32> to vector<16x128xf32>
    %126 = arith.addf %123, %125 : vector<16x128xf32>
    %cst_92 = arith.constant dense<0.000000e+00> : vector<160x128xf32>
    %127 = tpu.matmul %0, %121, %cst_92 {dimension_numbers = #tpu.dot_dimension_numbers<[1], [0], [0], [1], [0, 0, 1, 1], [], []>} : vector<160x16xbf16>, vector<16x128xbf16>, vector<160x128xf32> -> vector<160x128xf32>
    %128 = arith.truncf %127 : vector<160x128xf32> to vector<160x128xbf16>
    %129 = vector.extract_strided_slice %128 {offsets = [0, 0], sizes = [16, 128], strides = [1, 1]} : vector<160x128xbf16> to vector<16x128xbf16>
    %c0_93 = arith.constant 0 : index
    %c0_94 = arith.constant 0 : index
    %c0_95 = arith.constant 0 : index
    %130 = vector.load %arg10[%c0_93, %c0_94, %c0_95] : memref<10x128x128xbf16, #tpu.memory_space<vmem>>, vector<1x128x128xbf16>
    %131 = vector.shape_cast %130 : vector<1x128x128xbf16> to vector<128x128xbf16>
    %cst_96 = arith.constant dense<0.000000e+00> : vector<16x128xf32>
    %132 = tpu.matmul %129, %131, %cst_96 {dimension_numbers = #tpu.dot_dimension_numbers<[1], [0], [0], [1], [0, 0, 1, 1], [], []>} : vector<16x128xbf16>, vector<128x128xbf16>, vector<16x128xf32> -> vector<16x128xf32>
    %133 = arith.addf %126, %132 : vector<16x128xf32>
    %134 = vector.extract_strided_slice %128 {offsets = [16, 0], sizes = [16, 128], strides = [1, 1]} : vector<160x128xbf16> to vector<16x128xbf16>
    %c1_97 = arith.constant 1 : index
    %c0_98 = arith.constant 0 : index
    %c0_99 = arith.constant 0 : index
    %135 = vector.load %arg10[%c1_97, %c0_98, %c0_99] : memref<10x128x128xbf16, #tpu.memory_space<vmem>>, vector<1x128x128xbf16>
    %136 = vector.shape_cast %135 : vector<1x128x128xbf16> to vector<128x128xbf16>
    %cst_100 = arith.constant dense<0.000000e+00> : vector<16x128xf32>
    %137 = tpu.matmul %134, %136, %cst_100 {dimension_numbers = #tpu.dot_dimension_numbers<[1], [0], [0], [1], [0, 0, 1, 1], [], []>} : vector<16x128xbf16>, vector<128x128xbf16>, vector<16x128xf32> -> vector<16x128xf32>
    %138 = arith.addf %133, %137 : vector<16x128xf32>
    %139 = vector.extract_strided_slice %128 {offsets = [32, 0], sizes = [16, 128], strides = [1, 1]} : vector<160x128xbf16> to vector<16x128xbf16>
    %c2_101 = arith.constant 2 : index
    %c0_102 = arith.constant 0 : index
    %c0_103 = arith.constant 0 : index
    %140 = vector.load %arg10[%c2_101, %c0_102, %c0_103] : memref<10x128x128xbf16, #tpu.memory_space<vmem>>, vector<1x128x128xbf16>
    %141 = vector.shape_cast %140 : vector<1x128x128xbf16> to vector<128x128xbf16>
    %cst_104 = arith.constant dense<0.000000e+00> : vector<16x128xf32>
    %142 = tpu.matmul %139, %141, %cst_104 {dimension_numbers = #tpu.dot_dimension_numbers<[1], [0], [0], [1], [0, 0, 1, 1], [], []>} : vector<16x128xbf16>, vector<128x128xbf16>, vector<16x128xf32> -> vector<16x128xf32>
    %143 = arith.addf %138, %142 : vector<16x128xf32>
    %144 = vector.extract_strided_slice %128 {offsets = [48, 0], sizes = [16, 128], strides = [1, 1]} : vector<160x128xbf16> to vector<16x128xbf16>
    %c3_105 = arith.constant 3 : index
    %c0_106 = arith.constant 0 : index
    %c0_107 = arith.constant 0 : index
    %145 = vector.load %arg10[%c3_105, %c0_106, %c0_107] : memref<10x128x128xbf16, #tpu.memory_space<vmem>>, vector<1x128x128xbf16>
    %146 = vector.shape_cast %145 : vector<1x128x128xbf16> to vector<128x128xbf16>
    %cst_108 = arith.constant dense<0.000000e+00> : vector<16x128xf32>
    %147 = tpu.matmul %144, %146, %cst_108 {dimension_numbers = #tpu.dot_dimension_numbers<[1], [0], [0], [1], [0, 0, 1, 1], [], []>} : vector<16x128xbf16>, vector<128x128xbf16>, vector<16x128xf32> -> vector<16x128xf32>
    %148 = arith.addf %143, %147 : vector<16x128xf32>
    %149 = vector.extract_strided_slice %128 {offsets = [64, 0], sizes = [16, 128], strides = [1, 1]} : vector<160x128xbf16> to vector<16x128xbf16>
    %c4_109 = arith.constant 4 : index
    %c0_110 = arith.constant 0 : index
    %c0_111 = arith.constant 0 : index
    %150 = vector.load %arg10[%c4_109, %c0_110, %c0_111] : memref<10x128x128xbf16, #tpu.memory_space<vmem>>, vector<1x128x128xbf16>
    %151 = vector.shape_cast %150 : vector<1x128x128xbf16> to vector<128x128xbf16>
    %cst_112 = arith.constant dense<0.000000e+00> : vector<16x128xf32>
    %152 = tpu.matmul %149, %151, %cst_112 {dimension_numbers = #tpu.dot_dimension_numbers<[1], [0], [0], [1], [0, 0, 1, 1], [], []>} : vector<16x128xbf16>, vector<128x128xbf16>, vector<16x128xf32> -> vector<16x128xf32>
    %153 = arith.addf %148, %152 : vector<16x128xf32>
    %154 = vector.extract_strided_slice %128 {offsets = [80, 0], sizes = [16, 128], strides = [1, 1]} : vector<160x128xbf16> to vector<16x128xbf16>
    %c5_113 = arith.constant 5 : index
    %c0_114 = arith.constant 0 : index
    %c0_115 = arith.constant 0 : index
    %155 = vector.load %arg10[%c5_113, %c0_114, %c0_115] : memref<10x128x128xbf16, #tpu.memory_space<vmem>>, vector<1x128x128xbf16>
    %156 = vector.shape_cast %155 : vector<1x128x128xbf16> to vector<128x128xbf16>
    %cst_116 = arith.constant dense<0.000000e+00> : vector<16x128xf32>
    %157 = tpu.matmul %154, %156, %cst_116 {dimension_numbers = #tpu.dot_dimension_numbers<[1], [0], [0], [1], [0, 0, 1, 1], [], []>} : vector<16x128xbf16>, vector<128x128xbf16>, vector<16x128xf32> -> vector<16x128xf32>
    %158 = arith.addf %153, %157 : vector<16x128xf32>
    %159 = vector.extract_strided_slice %128 {offsets = [96, 0], sizes = [16, 128], strides = [1, 1]} : vector<160x128xbf16> to vector<16x128xbf16>
    %c6_117 = arith.constant 6 : index
    %c0_118 = arith.constant 0 : index
    %c0_119 = arith.constant 0 : index
    %160 = vector.load %arg10[%c6_117, %c0_118, %c0_119] : memref<10x128x128xbf16, #tpu.memory_space<vmem>>, vector<1x128x128xbf16>
    %161 = vector.shape_cast %160 : vector<1x128x128xbf16> to vector<128x128xbf16>
    %cst_120 = arith.constant dense<0.000000e+00> : vector<16x128xf32>
    %162 = tpu.matmul %159, %161, %cst_120 {dimension_numbers = #tpu.dot_dimension_numbers<[1], [0], [0], [1], [0, 0, 1, 1], [], []>} : vector<16x128xbf16>, vector<128x128xbf16>, vector<16x128xf32> -> vector<16x128xf32>
    %163 = arith.addf %158, %162 : vector<16x128xf32>
    %164 = vector.extract_strided_slice %128 {offsets = [112, 0], sizes = [16, 128], strides = [1, 1]} : vector<160x128xbf16> to vector<16x128xbf16>
    %c7_121 = arith.constant 7 : index
    %c0_122 = arith.constant 0 : index
    %c0_123 = arith.constant 0 : index
    %165 = vector.load %arg10[%c7_121, %c0_122, %c0_123] : memref<10x128x128xbf16, #tpu.memory_space<vmem>>, vector<1x128x128xbf16>
    %166 = vector.shape_cast %165 : vector<1x128x128xbf16> to vector<128x128xbf16>
    %cst_124 = arith.constant dense<0.000000e+00> : vector<16x128xf32>
    %167 = tpu.matmul %164, %166, %cst_124 {dimension_numbers = #tpu.dot_dimension_numbers<[1], [0], [0], [1], [0, 0, 1, 1], [], []>} : vector<16x128xbf16>, vector<128x128xbf16>, vector<16x128xf32> -> vector<16x128xf32>
    %168 = arith.addf %163, %167 : vector<16x128xf32>
    %169 = vector.extract_strided_slice %128 {offsets = [128, 0], sizes = [16, 128], strides = [1, 1]} : vector<160x128xbf16> to vector<16x128xbf16>
    %c8_125 = arith.constant 8 : index
    %c0_126 = arith.constant 0 : index
    %c0_127 = arith.constant 0 : index
    %170 = vector.load %arg10[%c8_125, %c0_126, %c0_127] : memref<10x128x128xbf16, #tpu.memory_space<vmem>>, vector<1x128x128xbf16>
    %171 = vector.shape_cast %170 : vector<1x128x128xbf16> to vector<128x128xbf16>
    %cst_128 = arith.constant dense<0.000000e+00> : vector<16x128xf32>
    %172 = tpu.matmul %169, %171, %cst_128 {dimension_numbers = #tpu.dot_dimension_numbers<[1], [0], [0], [1], [0, 0, 1, 1], [], []>} : vector<16x128xbf16>, vector<128x128xbf16>, vector<16x128xf32> -> vector<16x128xf32>
    %173 = arith.addf %168, %172 : vector<16x128xf32>
    %174 = vector.extract_strided_slice %128 {offsets = [144, 0], sizes = [16, 128], strides = [1, 1]} : vector<160x128xbf16> to vector<16x128xbf16>
    %c9_129 = arith.constant 9 : index
    %c0_130 = arith.constant 0 : index
    %c0_131 = arith.constant 0 : index
    %175 = vector.load %arg10[%c9_129, %c0_130, %c0_131] : memref<10x128x128xbf16, #tpu.memory_space<vmem>>, vector<1x128x128xbf16>
    %176 = vector.shape_cast %175 : vector<1x128x128xbf16> to vector<128x128xbf16>
    %cst_132 = arith.constant dense<0.000000e+00> : vector<16x128xf32>
    %177 = tpu.matmul %174, %176, %cst_132 {dimension_numbers = #tpu.dot_dimension_numbers<[1], [0], [0], [1], [0, 0, 1, 1], [], []>} : vector<16x128xbf16>, vector<128x128xbf16>, vector<16x128xf32> -> vector<16x128xf32>
    %178 = arith.addf %173, %177 : vector<16x128xf32>
    %179 = arith.truncf %178 : vector<16x128xf32> to vector<16x128xbf16>
    %c0_133 = arith.constant 0 : index
    %c0_134 = arith.constant 0 : index
    %180 = vector.load %arg0[%c0_133, %c0_134] : memref<2x16xbf16, #tpu.memory_space<vmem>>, vector<2x16xbf16>
    %cst_135 = arith.constant dense<0.000000e+00> : vector<2x128xf32>
    %181 = tpu.matmul %180, %179, %cst_135 {dimension_numbers = #tpu.dot_dimension_numbers<[1], [0], [0], [1], [0, 0, 1, 1], [], []>} : vector<2x16xbf16>, vector<16x128xbf16>, vector<2x128xf32> -> vector<2x128xf32>
    %182 = arith.truncf %181 : vector<2x128xf32> to vector<2x128xbf16>
    %c0_136 = arith.constant 0 : index
    %c0_137 = arith.constant 0 : index
    %183 = vector.load %arg1[%c0_136, %c0_137] : memref<2x16xbf16, #tpu.memory_space<vmem>>, vector<2x16xbf16>
    %cst_138 = arith.constant dense<0.000000e+00> : vector<2x128xf32>
    %184 = tpu.matmul %183, %179, %cst_138 {dimension_numbers = #tpu.dot_dimension_numbers<[1], [0], [0], [1], [0, 0, 1, 1], [], []>} : vector<2x16xbf16>, vector<16x128xbf16>, vector<2x128xf32> -> vector<2x128xf32>
    %185 = arith.truncf %184 : vector<2x128xf32> to vector<2x128xbf16>
    %c0_139 = arith.constant 0 : index
    %c0_140 = arith.constant 0 : index
    %186 = vector.load %arg13[%c0_139, %c0_140] : memref<128x256xbf16, #tpu.memory_space<vmem>>, vector<128x256xbf16>
    %cst_141 = arith.constant dense<0.000000e+00> : vector<2x256xf32>
    %187 = tpu.matmul %182, %186, %cst_141 {dimension_numbers = #tpu.dot_dimension_numbers<[1], [0], [0], [1], [0, 0, 1, 1], [], []>} : vector<2x128xbf16>, vector<128x256xbf16>, vector<2x256xf32> -> vector<2x256xf32>
    %c0_142 = arith.constant 0 : index
    %c0_143 = arith.constant 0 : index
    %188 = vector.load %arg14[%c0_142, %c0_143] : memref<128x256xbf16, #tpu.memory_space<vmem>>, vector<128x256xbf16>
    %cst_144 = arith.constant dense<0.000000e+00> : vector<2x256xf32>
    %189 = tpu.matmul %185, %188, %cst_144 {dimension_numbers = #tpu.dot_dimension_numbers<[1], [0], [0], [1], [0, 0, 1, 1], [], []>} : vector<2x128xbf16>, vector<128x256xbf16>, vector<2x256xf32> -> vector<2x256xf32>
    %190 = arith.addf %187, %189 : vector<2x256xf32>
    %c0_145 = arith.constant 0 : index
    %c0_146 = arith.constant 0 : index
    %191 = vector.load %arg15[%c0_145, %c0_146] : memref<1x256xf32, #tpu.memory_space<vmem>>, vector<1x256xf32>
    %192 = vector.broadcast %191 : vector<1x256xf32> to vector<2x256xf32>
    %193 = arith.addf %190, %192 : vector<2x256xf32>
    %cst_147 = arith.constant 0.000000e+00 : f32
    %194 = vector.broadcast %cst_147 : f32 to vector<2x256xf32>
    %195 = arith.maximumf %193, %194 : vector<2x256xf32>
    %c0_148 = arith.constant 0 : index
    %c0_149 = arith.constant 0 : index
    %196 = vector.load %arg16[%c0_148, %c0_149] : memref<1x256xbf16, #tpu.memory_space<vmem>>, vector<1x256xbf16>
    %197 = arith.extf %196 : vector<1x256xbf16> to vector<1x256xf32>
    %198 = vector.broadcast %197 : vector<1x256xf32> to vector<2x256xf32>
    %199 = arith.mulf %195, %198 : vector<2x256xf32>
    %cst_150 = arith.constant dense<0.000000e+00> : vector<2xf32>
    %200 = vector.multi_reduction <add>, %199, %cst_150 [1] : vector<2x256xf32> to vector<2xf32>
    %201 = vector.shape_cast %200 : vector<2xf32> to vector<2x1xf32>
    %c0_151 = arith.constant 0 : index
    %c0_152 = arith.constant 0 : index
    %202 = vector.load %arg17[%c0_151, %c0_152] : memref<1x1xf32, #tpu.memory_space<vmem>>, vector<1x1xf32>
    %203 = vector.broadcast %202 : vector<1x1xf32> to vector<2x1xf32>
    %204 = arith.addf %201, %203 : vector<2x1xf32>
    %c0_153 = arith.constant 0 : index
    %c0_154 = arith.constant 0 : index
    %205 = vector.load %arg18[%c0_153, %c0_154] : memref<2x1xf32, #tpu.memory_space<vmem>>, vector<2x1xf32>
    tpu.vector_store %arg18[%c0_153, %c0_154], %204 {strides = array<i32>} : memref<2x1xf32, #tpu.memory_space<vmem>>, vector<2x1xf32>,
    return
  }
}

</mosaic_0001>

<bundles_post_ra>
// kernel: tpu_custom_call.1
= control target key start
LH: loop header
LB: loop body
LE: loop exit
PB: predicated region body
PF: predicated region fallthrough
CT: control target
= control target key end

     0   :  { %s5795_s0 = inlined_call_operand.vmem [shape: bf16[2,16], index: 0, kind: input, shape index: {}]   ;;  %s5796_s1 = inlined_call_operand.vmem [shape: bf16[2,16], index: 1, kind: input, shape index: {}]   ;;  %s5797_s2 = inlined_call_operand.vmem [shape: bf16[160,16], index: 2, kind: input, shape index: {}]   ;;  %s5798_s3 = inlined_call_operand.vmem [shape: bf16[16,128], index: 3, kind: input, shape index: {}]   ;;  %s5799_s4 = inlined_call_operand.hbm [shape: bf16[10,128,128], index: 4, kind: input, shape index: {}]   ;;  %s5800_s5 = inlined_call_operand.vmem [shape: bf16[128,128], index: 5, kind: input, shape index: {}]   ;;  %s5801_s6 = inlined_call_operand.vmem [shape: f32[1,128], index: 6, kind: input, shape index: {}]   ;;  %s5802_s7 = inlined_call_operand.hbm [shape: bf16[10,128,128], index: 7, kind: input, shape index: {}]   ;;  %s5803_s8 = inlined_call_operand.hbm [shape: bf16[128,128], index: 8, kind: input, shape index: {}]   ;;  %s5804_s9 = inlined_call_operand.vmem [shape: f32[1,128], index: 9, kind: input, shape index: {}]   ;;  %s5805_s10 = inlined_call_operand.hbm [shape: bf16[10,128,128], index: 10, kind: input, shape index: {}]   ;;  %s5806_s11 = inlined_call_operand.hbm [shape: bf16[128,128], index: 11, kind: input, shape index: {}]   ;;  %s5807_s12 = inlined_call_operand.vmem [shape: f32[1,128], index: 12, kind: input, shape index: {}]   ;;  %s5808_s13 = inlined_call_operand.hbm [shape: bf16[128,256], index: 13, kind: input, shape index: {}]   ;;  %s5809_s14 = inlined_call_operand.hbm [shape: bf16[128,256], index: 14, kind: input, shape index: {}]   ;;  %s5810_s15 = inlined_call_operand.vmem [shape: f32[1,256], index: 15, kind: input, shape index: {}]   ;;  %s5811_s16 = inlined_call_operand.vmem [shape: bf16[1,256], index: 16, kind: input, shape index: {}]   ;;  %s5812_s17 = inlined_call_operand.<no memory space> [shape: f32[1,1], index: 17, kind: input, shape index: {}]   ;;  %s5813_s18 = inlined_call_operand.vmem [shape: f32[2,1], index: 18, kind: output, shape index: {}]  }
   0x1   :  { %5815 = sst [smem:[#allocation18_spill]] %s5795_s0  ;;  %v23_v0 = vstv %s5812_s17 }
   0x2   :  { %5816 = sst [smem:[#allocation19_spill]] %s5796_s1  ;;  %24 = vst [vmem:[#allocation2] sm:$0x1] %v23_v0 }
   0x3   :  { %5817 = sst [smem:[#allocation20_spill]] %s5797_s2 }
   0x4   :  { %25 = vsyncpa [#allocation4], 0 }
   0x5   :  { %26 = vsyncpa [#allocation6], 0 }
   0x6   :  { %27 = vsyncpa [#allocation9], 0 }
   0x7   :  { %28 = vsyncpa [#allocation12], 0  ;;  %s58_s0 = sshll.u32 %s5802_s7, 4  ;;  %s5467_s19 = smov [#allocation5]   ;;  %s59_s0 = int_to_ptr.hbm [resolvable:$true] %s58_s0 }
   0x8   :  { %s60_s1 = sshll.u32 %s5467_s19, 4  ;;  %s86_s22 = sshll.u32 %s5805_s10, 4  ;;  %s61_s1 = int_to_ptr.vmem [resolvable:$true] %s60_s1  ;;  %s87_s22 = int_to_ptr.hbm [resolvable:$true] %s86_s22 }
   0x9   :  { %s5468_s2 = smov 64   ;;  %s5469_s23 = smov 4  }
   0xa   :  { %66 = dma.hbm_to_vmem [thread:$0]  %s59_s0, 10240, %s61_s1, [#allocation6], %s5468_s2, %s5468_s2, %s5469_s23  }
   0xb   :  { %s5470_s17 = smov [#allocation8]   ;;  %s114_s7 = sshll.u32 %s5808_s13, 4  ;;  %s115_s7 = int_to_ptr.hbm [resolvable:$true] %s114_s7 }
   0xc   :  { %s88_s24 = sshll.u32 %s5470_s17, 4  ;;  %s5471_s10 = smov [#allocation11]   ;;  %s89_s24 = int_to_ptr.vmem [resolvable:$true] %s88_s24 }
   0xd   :  { %94 = dma.hbm_to_vmem [thread:$0]  %s87_s22, 10240, %s89_s24, [#allocation9], %s5468_s2, %s5468_s2, %s5469_s23  }
   0xe   :  { %s116_s27 = sshll.u32 %s5471_s10, 4  ;;  %s41_s30 = sshll.u32 %s5799_s4, 4  ;;  %s117_s27 = int_to_ptr.vmem [resolvable:$true] %s116_s27  ;;  %s42_s30 = int_to_ptr.hbm [resolvable:$true] %s41_s30 }
   0xf   :  { %s5472_s0 = smov 128   ;;  %s5473_s19 = smov 8  }
  0x10   :  { %122 = dma.hbm_to_vmem [thread:$0]  %s115_s7, 2048, %s117_s27, [#allocation12], %s5472_s0, %s5472_s0, %s5473_s19  }
  0x11   :  { %s5474_s1 = smov [#allocation3]   ;;  %s71_s17 = sshll.u32 %s5803_s8, 4  ;;  %s72_s17 = int_to_ptr.hbm [resolvable:$true] %s71_s17 }
  0x12   :  { %s43_s20 = sshll.u32 %s5474_s1, 4  ;;  %s99_s4 = sshll.u32 %s5806_s11, 4  ;;  %s44_s20 = int_to_ptr.vmem [resolvable:$true] %s43_s20  ;;  %s100_s4 = int_to_ptr.hbm [resolvable:$true] %s99_s4 }
  0x13   :  { %49 = dma.hbm_to_vmem [thread:$0]  %s42_s30, 10240, %s44_s20, [#allocation4], %s5468_s2, %s5468_s2, %s5469_s23  }
  0x14   :  { %s5475_s25 = smov [#allocation7]   ;;  %s5476_s7 = smov [#allocation10]  }
  0x15   :  { %s73_s26 = sshll.u32 %s5475_s25, 4  ;;  %s101_s8 = sshll.u32 %s5476_s7, 4  ;;  %s74_s26 = int_to_ptr.vmem [resolvable:$true] %s73_s26  ;;  %s102_s8 = int_to_ptr.vmem [resolvable:$true] %s101_s8 }
  0x16   :  { %79 = dma.hbm_to_vmem [thread:$0]  %s72_s17, 1024, %s74_s26, [#allocation6], %s5468_s2, %s5468_s2, %s5469_s23  }
  0x17   :  { %s127_s28 = sshll.u32 %s5809_s14, 4  ;;  %s5477_s11 = smov [#allocation13]   ;;  %s128_s28 = int_to_ptr.hbm [resolvable:$true] %s127_s28 }
  0x18   :  { %107 = dma.hbm_to_vmem [thread:$0]  %s100_s4, 1024, %s102_s8, [#allocation9], %s5468_s2, %s5468_s2, %s5469_s23  }
  0x19   :  { %s129_s29 = sshll.u32 %s5477_s11, 4  ;;  %s130_s29 = int_to_ptr.vmem [resolvable:$true] %s129_s29 }
  0x1a   :  { %135 = dma.hbm_to_vmem [thread:$0]  %s128_s28, 2048, %s130_s29, [#allocation12], %s5472_s0, %s5472_s0, %s5473_s19  }
  0x1b   :  { %5459 = dma.done.wait [#allocation4], 10240  }
  0x1c   :  { %5460 = vsyncadd [#allocation4], 4294957056 }
  0x1d   :  { %5461 = dma.done.wait [#allocation6], 11264  }
  0x1e   :  { %5462 = vsyncadd [#allocation6], 4294956032 }
  0x1f   :  { %5463 = dma.done.wait [#allocation9], 11264  }
  0x20   :  { %5464 = vsyncadd [#allocation9], 4294956032 }
  0x21   :  { %5465 = dma.done.wait [#allocation12], 4096  }
  0x22   :  { %5466 = vsyncadd [#allocation12], 4294963200  ;;  %v4969_v1 = vld [vmem:[%s5798_s3] sm:$0xff]  ;;  %s5818_s2 = sld [smem:[#allocation20_spill]]  ;;  %vm331_vm0 = vcmask 130048   ;;  %v4977_v8 = vld [vmem:[%s5800_s5 + $0x38] sm:$0xff] }
  0x23   :  { %369 = vmatpush.bf16.msra.mxu1 %v4969_v1  ;;  %v4985_v7 = vld [vmem:[#allocation3 + $0x38] sm:$0xff]  ;;  %267 = vmatpush.bf16.msra.mxu0 %v4977_v8  ;;  %v4984_v10 = vld [vmem:[#allocation3 + $0x30] sm:$0xff]  ;;  %v4983_v12 = vld [vmem:[#allocation3 + $0x28] sm:$0xff]  ;;  %s5819_s25 = sld [smem:[#allocation18_spill]]  ;;  %vm3678_vm1 = vcmask 1041408   ;;  %vm3689_vm2 = vcmask 1024  }
  0x24   :  { %511 = vmatpush.bf16.msra.mxu2 %v4985_v7  ;;  %v4976_v11 = vld [vmem:[%s5800_s5 + $0x30] sm:$0xff]  ;;  %v4975_v13 = vld [vmem:[%s5800_s5 + $0x28] sm:$0xff]  ;;  %v4974_v15 = vld [vmem:[%s5800_s5 + $0x20] sm:$0xff]  ;;  %s5820_s7 = sld [smem:[#allocation19_spill]] }
  0x25   :  { %v4982_v14 = vld [vmem:[#allocation3 + $0x20] sm:$0xff]  ;;  %v4981_v16 = vld [vmem:[#allocation3 + $0x18] sm:$0xff]  ;;  %v4980_v20 = vld [vmem:[#allocation3 + $0x10] sm:$0xff] }
  0x26   :  { %v4993_v17 = vld [vmem:[#allocation3 + $0x78] sm:$0xff]  ;;  %v4992_v21 = vld [vmem:[#allocation3 + $0x70] sm:$0xff]  ;;  %v4979_v23 = vld [vmem:[#allocation3 + $0x8] sm:$0xff] }
  0x27   :  { %268 = vmatpush.bf16.msra.mxu0 %v4976_v11  ;;  %598 = vmatpush.bf16.msra.mxu3 %v4993_v17  ;;  %v4973_v19 = vld [vmem:[%s5800_s5 + $0x18] sm:$0xff]  ;;  %v4972_v22 = vld [vmem:[%s5800_s5 + $0x10] sm:$0xff]  ;;  %v4971_v25 = vld [vmem:[%s5800_s5 + $0x8] sm:$0xff] }
  0x28   :  { %v5618_v2 = vld [vmem:[%s5818_s2] sm:$0xff]  ;;  %v5625_v3 = vld [vmem:[%s5818_s2 + $0x8] sm:$0xff]  ;;  %v5632_v4 = vld [vmem:[%s5818_s2 + $0x10] sm:$0xff]  ;;  %512 = vmatpush.bf16.msra.mxu2 %v4984_v10 }
  0x29   :  { %3775 = vmatmul.msk.bf16.vlgmr.msra.gmra.mxu1 %vm331_vm0, %v5618_v2  ;;  %v5639_v5 = vld [vmem:[%s5818_s2 + $0x18] sm:$0xff]  ;;  %v5646_v6 = vld [vmem:[%s5818_s2 + $0x20] sm:$0xff]  ;;  %v5656_v9 = vld [vmem:[%s5818_s2 + $0x28] sm:$0xff] }
  0x2a   :  { %v5672_v18 = vld [vmem:[%s5818_s2 + $0x30] sm:$0xff]  ;;  %v4978_v26 = vld [vmem:[#allocation3] sm:$0xff]  ;;  %v4989_v29 = vld [vmem:[#allocation3 + $0x58] sm:$0xff] }
  0x2b   :  { %269 = vmatpush.bf16.msra.mxu0 %v4975_v13  ;;  %599 = vmatpush.bf16.msra.mxu3 %v4992_v21  ;;  %v4991_v24 = vld [vmem:[#allocation3 + $0x68] sm:$0xff]  ;;  %v4990_v27 = vld [vmem:[#allocation3 + $0x60] sm:$0xff]  ;;  %v5001_v30 = vld [vmem:[#allocation3 + $0xb8] sm:$0xff] }
  0x2c   :  { %513 = vmatpush.bf16.msra.mxu2 %v4983_v12  ;;  %v4970_v28 = vld [vmem:[%s5800_s5] sm:$0xff]  ;;  %v5691_v31 = vld [vmem:[%s5818_s2 + $0x38] sm:$0xff]  ;;  %v4987_v34 = vld [vmem:[#allocation3 + $0x48] sm:$0xff] }
  0x2d   :  { %v4988_v32 = vld [vmem:[#allocation3 + $0x50] sm:$0xff]  ;;  %v4999_v35 = vld [vmem:[#allocation3 + $0xa8] sm:$0xff]  ;;  %v4986_v36 = vld [vmem:[#allocation3 + $0x40] sm:$0xff] }
  0x2e   :  { %v5000_v33 = vld [vmem:[#allocation3 + $0xb0] sm:$0xff]  ;;  %v4998_v37 = vld [vmem:[#allocation3 + $0xa0] sm:$0xff]  ;;  %v4997_v38 = vld [vmem:[#allocation3 + $0x98] sm:$0xff] }
  0x2f   :  { %270 = vmatpush.bf16.msra.mxu0 %v4974_v15  ;;  %600 = vmatpush.bf16.msra.mxu3 %v4991_v24  ;;  %v5009_v39 = vld [vmem:[#allocation3 + $0xf8] sm:$0xff]  ;;  %v4996_v42 = vld [vmem:[#allocation3 + $0x90] sm:$0xff]  ;;  %v4995_v44 = vld [vmem:[#allocation3 + $0x88] sm:$0xff] }
  0x30   :  { %514 = vmatpush.bf16.msra.mxu2 %v4982_v14  ;;  %v5698_v40 = vld [vmem:[%s5818_s2 + $0x40] sm:$0xff]  ;;  %v5008_v43 = vld [vmem:[#allocation3 + $0xf0] sm:$0xff]  ;;  %v5007_v45 = vld [vmem:[#allocation3 + $0xe8] sm:$0xff] }
  0x31   :  { %v4994_v49 = vld [vmem:[#allocation3 + $0x80] sm:$0xff]  ;;  %v5005_v54 = vld [vmem:[#allocation3 + $0xd8] sm:$0xff]  ;;  %v5004_v58 = vld [vmem:[#allocation3 + $0xd0] sm:$0xff] }
  0x32   :  { %v5006_v50 = vld [vmem:[#allocation3 + $0xe0] sm:$0xff]  ;;  %v5017_v55 = vld [vmem:[#allocation3 + $0x138] sm:$0xff]  ;;  %v5016_v59 = vld [vmem:[#allocation3 + $0x130] sm:$0xff] }
  0x33   :  { %271 = vmatpush.bf16.msra.mxu0 %v4973_v19  ;;  %601 = vmatpush.bf16.msra.mxu3 %v4990_v27  ;;  %v5705_v56 = vld [vmem:[%s5818_s2 + $0x48] sm:$0xff]  ;;  %v5013_v12 = vld [vmem:[#allocation3 + $0x118] sm:$0xff]  ;;  %v5012_v15 = vld [vmem:[#allocation3 + $0x110] sm:$0xff] }
  0x34   :  { %515 = vmatpush.bf16.msra.mxu2 %v4981_v16  ;;  %v5003_v60 = vld [vmem:[#allocation3 + $0xc8] sm:$0xff]  ;;  %v5014_v7 = vld [vmem:[#allocation3 + $0x120] sm:$0xff]  ;;  %v5025_v13 = vld [vmem:[#allocation3 + $0x178] sm:$0xff] }
  0x35   :  { %v5015_v61 = vld [vmem:[#allocation3 + $0x128] sm:$0xff]  ;;  %v5024_v16 = vld [vmem:[#allocation3 + $0x170] sm:$0xff]  ;;  %v5022_v24 = vld [vmem:[#allocation3 + $0x160] sm:$0xff] }
  0x36   :  { %v5011_v17 = vld [vmem:[#allocation3 + $0x108] sm:$0xff] }
  0x37   :  { %272 = vmatpush.bf16.msra.mxu0 %v4972_v22  ;;  %602 = vmatpush.bf16.msra.mxu3 %v4989_v29  ;;  %v5023_v19 = vld [vmem:[#allocation3 + $0x168] sm:$0xff]  ;;  %v5033_v29 = vld [vmem:[#allocation3 + $0x1b8] sm:$0xff] }
  0x38   :  { %516 = vmatpush.bf16.msra.mxu2 %v4980_v20 }
  0x39   :  { %3776 = vmatmul.msk.bf16.gmra.mxu1 %vm331_vm0, %v5625_v3 }
  0x3b   :  { %273 = vmatpush.bf16.msra.mxu0 %v4971_v25  ;;  %603 = vmatpush.bf16.msra.mxu3 %v4988_v32  ;;  %v5020_v32 = vld [vmem:[#allocation3 + $0x150] sm:$0xff] }
  0x3c   :  { %517 = vmatpush.bf16.msra.mxu2 %v4979_v23  ;;  %v5010_v23 = vld [vmem:[#allocation3 + $0x100] sm:$0xff] }
  0x3f   :  { %274 = vmatpush.bf16.msra.mxu0 %v4970_v28  ;;  %604 = vmatpush.bf16.msra.mxu3 %v4987_v34  ;;  %v5021_v28 = vld [vmem:[#allocation3 + $0x158] sm:$0xff]  ;;  %v5019_v34 = vld [vmem:[#allocation3 + $0x148] sm:$0xff] }
  0x40   :  { %518 = vmatpush.bf16.msra.mxu2 %v4978_v26 }
  0x42   :  { %275 = vmatmul.bf16.vlgmr.msra.gmra.mxu0 %v4969_v1  ;;  %v5002_v1 = vld [vmem:[#allocation3 + $0xc0] sm:$0xff] }
  0x43   :  { %685 = vmatpush.bf16.msrb.mxu0 %v5001_v30  ;;  %605 = vmatpush.bf16.msra.mxu3 %v4986_v36 }
  0x44   :  { %772 = vmatpush.bf16.msrb.mxu2 %v5009_v39  ;;  %v5018_v39 = vld [vmem:[#allocation3 + $0x140] sm:$0xff] }
  0x47   :  { %686 = vmatpush.bf16.msrb.mxu0 %v5000_v33  ;;  %859 = vmatpush.bf16.msrb.mxu3 %v5017_v55  ;;  %v5032_v33 = vld [vmem:[#allocation3 + $0x1b0] sm:$0xff]  ;;  %v5026_v55 = vld [vmem:[#allocation3 + $0x180] sm:$0xff] }
  0x48   :  { %773 = vmatpush.bf16.msrb.mxu2 %v5008_v43 }
  0x49   :  { %3777 = vmatmul.msk.bf16.gmra.mxu1 %vm331_vm0, %v5632_v4 }
  0x4b   :  { %687 = vmatpush.bf16.msrb.mxu0 %v4999_v35  ;;  %860 = vmatpush.bf16.msrb.mxu3 %v5016_v59  ;;  %v5031_v35 = vld [vmem:[#allocation3 + $0x1a8] sm:$0xff] }
  0x4c   :  { %774 = vmatpush.bf16.msrb.mxu2 %v5007_v45  ;;  %v5029_v45 = vld [vmem:[#allocation3 + $0x198] sm:$0xff] }
  0x4f   :  { %688 = vmatpush.bf16.msrb.mxu0 %v4998_v37  ;;  %861 = vmatpush.bf16.msrb.mxu3 %v5015_v61  ;;  %v5037_v61 = vld [vmem:[#allocation3 + $0x1d8] sm:$0xff] }
  0x50   :  { %775 = vmatpush.bf16.msrb.mxu2 %v5006_v50  ;;  %v5027_v50 = vld [vmem:[#allocation3 + $0x188] sm:$0xff] }
  0x53   :  { %689 = vmatpush.bf16.msrb.mxu0 %v4997_v38  ;;  %862 = vmatpush.bf16.msrb.mxu3 %v5014_v7  ;;  %v5035_v7 = vld [vmem:[#allocation3 + $0x1c8] sm:$0xff] }
  0x54   :  { %776 = vmatpush.bf16.msrb.mxu2 %v5005_v54 }
  0x57   :  { %690 = vmatpush.bf16.msrb.mxu0 %v4996_v42  ;;  %863 = vmatpush.bf16.msrb.mxu3 %v5013_v12 }
  0x58   :  { %777 = vmatpush.bf16.msrb.mxu2 %v5004_v58 }
  0x59   :  { %3778 = vmatmul.msk.bf16.gmra.mxu1 %vm331_vm0, %v5639_v5 }
  0x5b   :  { %691 = vmatpush.bf16.msrb.mxu0 %v4995_v44  ;;  %864 = vmatpush.bf16.msrb.mxu3 %v5012_v15 }
  0x5c   :  { %778 = vmatpush.bf16.msrb.mxu2 %v5003_v60 }
  0x5f   :  { %692 = vmatpush.bf16.msrb.mxu0 %v4994_v49  ;;  %865 = vmatpush.bf16.msrb.mxu3 %v5011_v17  ;;  %v5040_v49 = vld [vmem:[#allocation3 + $0x1f0] sm:$0xff] }
  0x60   :  { %779 = vmatpush.bf16.msrb.mxu2 %v5002_v1  ;;  %v5048_v1 = vld [vmem:[#allocation3 + $0x230] sm:$0xff] }
  0x63   :  { %946 = vmatpush.bf16.msra.mxu0 %v5025_v13  ;;  %866 = vmatpush.bf16.msrb.mxu3 %v5010_v23  ;;  %v5034_v13 = vld [vmem:[#allocation3 + $0x1c0] sm:$0xff]  ;;  %v5056_v23 = vld [vmem:[#allocation3 + $0x270] sm:$0xff] }
  0x67   :  { %947 = vmatpush.bf16.msra.mxu0 %v5024_v16 }
  0x69   :  { %3779 = vmatmul.msk.bf16.gmra.mxu1 %vm331_vm0, %v5646_v6 }
  0x6b   :  { %948 = vmatpush.bf16.msra.mxu0 %v5023_v19  ;;  %v5045_v19 = vld [vmem:[#allocation3 + $0x218] sm:$0xff] }
  0x6f   :  { %949 = vmatpush.bf16.msra.mxu0 %v5022_v24  ;;  %v5043_v24 = vld [vmem:[#allocation3 + $0x208] sm:$0xff] }
  0x73   :  { %950 = vmatpush.bf16.msra.mxu0 %v5021_v28 }
  0x77   :  { %951 = vmatpush.bf16.msra.mxu0 %v5020_v32 }
  0x79   :  { %3780 = vmatmul.msk.bf16.gmra.mxu1 %vm331_vm0, %v5656_v9 }
  0x7b   :  { %952 = vmatpush.bf16.msra.mxu0 %v5019_v34 }
  0x7f   :  { %953 = vmatpush.bf16.msra.mxu0 %v5018_v39 }
  0x89   :  { %3781 = vmatmul.msk.bf16.gmra.mxu1 %vm331_vm0, %v5672_v18 }
  0x99   :  { %3782 = vmatmul.msk.bf16.gmra.mxu1 %vm331_vm0, %v5691_v31 }
  0xa6   :  { %v371_v41 = vpop.f32.mrf.mxu1 }
  0xa7   :  { %v421_v46 = vpack.c.bf16 %v371_v41, %v371_v41  ;;  %v5030_v41 = vld [vmem:[#allocation3 + $0x1a0] sm:$0xff] }
  0xa9   :  { %3783 = vmatmul.msk.bf16.gmra.mxu1 %vm331_vm0, %v5698_v40  ;;  %v459_v51 = vunpack.c.l.b16 %v421_v46  ;;  %v5041_v46 = vld [vmem:[#allocation3 + $0x1f8] sm:$0xff] }
  0xae   :  { %v373_v47 = vpop.f32.mrf.mxu1 }
  0xaf   :  { %v422_v48 = vpack.c.bf16 %v373_v47, %v373_v47 }
  0xb1   :  { %v460_v52 = vunpack.c.l.b16 %v422_v48  ;;  %v5028_v48 = vld [vmem:[#allocation3 + $0x190] sm:$0xff] }
  0xb3   :  { %v461_v53 = vpack.c.b16 %v460_v52, %v459_v51  ;;  %v5039_v51 = vld [vmem:[#allocation3 + $0x1e8] sm:$0xff] }
  0xb5   :  { %519 = vmatmul.bf16.vlgmr.msra.gmra.mxu2 %v461_v53 }
  0xb6   :  { %v376_v57 = vpop.f32.mrf.mxu1  ;;  %1033 = vmatpush.bf16.msra.mxu2 %v5033_v29  ;;  %v5042_v29 = vld [vmem:[#allocation3 + $0x200] sm:$0xff] }
  0xb7   :  { %v423_v62 = vpack.c.bf16 %v376_v57, %v376_v57  ;;  %v5038_v57 = vld [vmem:[#allocation3 + $0x1e0] sm:$0xff] }
  0xb9   :  { %3784 = vmatmul.msk.bf16.gmra.mxu1 %vm331_vm0, %v5705_v56  ;;  %v546_v8 = vunpack.c.l.b16 %v423_v62  ;;  %v5049_v62 = vld [vmem:[#allocation3 + $0x238] sm:$0xff] }
  0xba   :  { %1034 = vmatpush.bf16.msra.mxu2 %v5032_v33 }
  0xbe   :  { %v378_v63 = vpop.f32.mrf.mxu1  ;;  %1035 = vmatpush.bf16.msra.mxu2 %v5031_v35  ;;  %v5053_v35 = vld [vmem:[#allocation3 + $0x258] sm:$0xff] }
  0xbf   :  { %v424_v0 = vpack.c.bf16 %v378_v63, %v378_v63 }
  0xc1   :  { %v547_v10 = vunpack.c.l.b16 %v424_v0  ;;  %v5036_v0 = vld [vmem:[#allocation3 + $0x1d0] sm:$0xff] }
  0xc2   :  { %1036 = vmatpush.bf16.msra.mxu2 %v5030_v41 }
  0xc3   :  { %v548_v11 = vpack.c.b16 %v547_v10, %v546_v8  ;;  %v5047_v8 = vld [vmem:[#allocation3 + $0x228] sm:$0xff] }
  0xc5   :  { %606 = vmatmul.bf16.vlgmr.msra.gmra.mxu3 %v548_v11 }
  0xc6   :  { %v381_v14 = vpop.f32.mrf.mxu1  ;;  %1037 = vmatpush.bf16.msra.mxu2 %v5029_v45  ;;  %1120 = vmatpush.bf16.msra.mxu3 %v5041_v46 }
  0xc7   :  { %v425_v20 = vpack.c.bf16 %v381_v14, %v381_v14  ;;  %v5046_v14 = vld [vmem:[#allocation3 + $0x220] sm:$0xff] }
  0xc9   :  { %v633_v25 = vunpack.c.l.b16 %v425_v20  ;;  %v5057_v20 = vld [vmem:[#allocation3 + $0x278] sm:$0xff] }
  0xca   :  { %1038 = vmatpush.bf16.msra.mxu2 %v5028_v48  ;;  %1121 = vmatpush.bf16.msra.mxu3 %v5040_v49 }
  0xce   :  { %v383_v21 = vpop.f32.mrf.mxu1  ;;  %1039 = vmatpush.bf16.msra.mxu2 %v5027_v50  ;;  %1122 = vmatpush.bf16.msra.mxu3 %v5039_v51 }
  0xcf   :  { %v426_v22 = vpack.c.bf16 %v383_v21, %v383_v21 }
  0xd1   :  { %v634_v26 = vunpack.c.l.b16 %v426_v22  ;;  %v5044_v22 = vld [vmem:[#allocation3 + $0x210] sm:$0xff] }
  0xd2   :  { %1040 = vmatpush.bf16.msra.mxu2 %v5026_v55  ;;  %1123 = vmatpush.bf16.msra.mxu3 %v5038_v57 }
  0xd3   :  { %v635_v27 = vpack.c.b16 %v634_v26, %v633_v25  ;;  %v5055_v25 = vld [vmem:[#allocation3 + $0x268] sm:$0xff] }
  0xd5   :  { %693 = vmatmul.bf16.vlgmr.msrb.gmra.mxu0 %v635_v27 }
  0xd6   :  { %v386_v30 = vpop.f32.mrf.mxu1  ;;  %1124 = vmatpush.bf16.msra.mxu3 %v5037_v61  ;;  %1207 = vmatpush.bf16.msrb.mxu0 %v5049_v62  ;;  %v276_v62 = vpop.f32.mrf.mxu0 }
  0xd7   :  { %v427_v36 = vpack.c.bf16 %v386_v30, %v386_v30  ;;  %v5054_v30 = vld [vmem:[#allocation3 + $0x260] sm:$0xff] }
  0xd9   :  { %v720_v42 = vunpack.c.l.b16 %v427_v36 }
  0xda   :  { %1125 = vmatpush.bf16.msra.mxu3 %v5036_v0  ;;  %1208 = vmatpush.bf16.msrb.mxu0 %v5048_v1  ;;  %v5065_v0 = vld [vmem:[#allocation7 + $0x38] sm:$0xff] }
  0xde   :  { %v388_v37 = vpop.f32.mrf.mxu1  ;;  %1126 = vmatpush.bf16.msra.mxu3 %v5035_v7  ;;  %1209 = vmatpush.bf16.msrb.mxu0 %v5047_v8  ;;  %v278_v1 = vpop.f32.mrf.mxu0  ;;  %v5064_v7 = vld [vmem:[#allocation7 + $0x30] sm:$0xff] }
  0xdf   :  { %v428_v38 = vpack.c.bf16 %v388_v37, %v388_v37  ;;  %v5052_v37 = vld [vmem:[#allocation3 + $0x250] sm:$0xff] }
  0xe1   :  { %v721_v43 = vunpack.c.l.b16 %v428_v38  ;;  %v5051_v38 = vld [vmem:[#allocation3 + $0x248] sm:$0xff] }
  0xe2   :  { %1127 = vmatpush.bf16.msra.mxu3 %v5034_v13  ;;  %1210 = vmatpush.bf16.msrb.mxu0 %v5046_v14  ;;  %v5062_v13 = vld [vmem:[#allocation7 + $0x20] sm:$0xff] }
  0xe3   :  { %v722_v44 = vpack.c.b16 %v721_v43, %v720_v42  ;;  %v5050_v43 = vld [vmem:[#allocation3 + $0x240] sm:$0xff] }
  0xe5   :  { %780 = vmatmul.bf16.vlgmr.msrb.gmra.mxu2 %v722_v44 }
  0xe6   :  { %v391_v47 = vpop.f32.mrf.mxu1  ;;  %1211 = vmatpush.bf16.msrb.mxu0 %v5045_v19  ;;  %1294 = vmatpush.bf16.msrb.mxu2 %v5057_v20  ;;  %v5060_v19 = vld [vmem:[#allocation7 + $0x10] sm:$0xff] }
  0xe7   :  { %v429_v52 = vpack.c.bf16 %v391_v47, %v391_v47 }
  0xe9   :  { %v807_v58 = vunpack.c.l.b16 %v429_v52 }
  0xea   :  { %1212 = vmatpush.bf16.msrb.mxu0 %v5044_v22  ;;  %1295 = vmatpush.bf16.msrb.mxu2 %v5056_v23  ;;  %v5059_v22 = vld [vmem:[#allocation7 + $0x8] sm:$0xff] }
  0xee   :  { %v393_v53 = vpop.f32.mrf.mxu1  ;;  %1213 = vmatpush.bf16.msrb.mxu0 %v5043_v24  ;;  %1296 = vmatpush.bf16.msrb.mxu2 %v5055_v25  ;;  %v5058_v24 = vld [vmem:[#allocation7] sm:$0xff]  ;;  %v5277_v25 = vld [vmem:[%s5801_s6] ss:$0 sm:$0xff] }
  0xef   :  { %v430_v54 = vpack.c.bf16 %v393_v53, %v393_v53 }
  0xf1   :  { %v808_v59 = vunpack.c.l.b16 %v430_v54 }
  0xf2   :  { %1214 = vmatpush.bf16.msrb.mxu0 %v5042_v29  ;;  %1297 = vmatpush.bf16.msrb.mxu2 %v5054_v30  ;;  %v279_v30 = vadd.f32 %v5277_v25, %v278_v1  ;;  %v5089_v1 = vld [vmem:[#allocation5 + $0xb8] sm:$0xff] }
  0xf3   :  { %v809_v60 = vpack.c.b16 %v808_v59, %v807_v58  ;;  %1718 = vmatpush.bf16.msrb.mxu1 %v5089_v1  ;;  %v5109_v1 = vld [vmem:[#allocation5 + $0x158] sm:$0xff] }
  0xf5   :  { %867 = vmatmul.bf16.vlgmr.msrb.gmra.mxu3 %v809_v60 }
  0xf6   :  { %v396_v63 = vpop.f32.mrf.mxu1  ;;  %1298 = vmatpush.bf16.msrb.mxu2 %v5053_v35  ;;  %1381 = vmatpush.bf16.msrb.mxu3 %v5065_v0  ;;  %v5073_v0 = vld [vmem:[#allocation5 + $0x38] sm:$0xff] }
  0xf7   :  { %v431_v10 = vpack.c.bf16 %v396_v63, %v396_v63 }
  0xf9   :  { %v894_v15 = vunpack.c.l.b16 %v431_v10 }
  0xfa   :  { %1299 = vmatpush.bf16.msrb.mxu2 %v5052_v37  ;;  %1382 = vmatpush.bf16.msrb.mxu3 %v5064_v7  ;;  %v5072_v7 = vld [vmem:[#allocation5 + $0x30] sm:$0xff] }
  0xfe   :  { %v398_v11 = vpop.f32.mrf.mxu1  ;;  %1300 = vmatpush.bf16.msrb.mxu2 %v5051_v38 }
  0xff   :  { %v432_v12 = vpack.c.bf16 %v398_v11, %v398_v11  ;;  %v5063_v11 = vld [vmem:[#allocation7 + $0x28] sm:$0xff] }
 0x100   :  { %1383 = vmatpush.bf16.msrb.mxu3 %v5063_v11  ;;  %v5067_v11 = vld [vmem:[#allocation5 + $0x8] sm:$0xff] }
 0x101   :  { %v895_v16 = vunpack.c.l.b16 %v432_v12 }
 0x102   :  { %1301 = vmatpush.bf16.msrb.mxu2 %v5050_v43 }
 0x103   :  { %v896_v17 = vpack.c.b16 %v895_v16, %v894_v15  ;;  %v5061_v16 = vld [vmem:[#allocation7 + $0x18] sm:$0xff] }
 0x104   :  { %1384 = vmatpush.bf16.msrb.mxu3 %v5062_v13  ;;  %v5078_v13 = vld [vmem:[#allocation5 + $0x60] sm:$0xff] }
 0x105   :  { %954 = vmatmul.bf16.vlgmr.msra.gmra.mxu0 %v896_v17 }
 0x106   :  { %v401_v21 = vpop.f32.mrf.mxu1 }
 0x107   :  { %v433_v26 = vpack.c.bf16 %v401_v21, %v401_v21 }
 0x108   :  { %1385 = vmatpush.bf16.msrb.mxu3 %v5061_v16  ;;  %v5087_v16 = vld [vmem:[#allocation5 + $0xa8] sm:$0xff] }
 0x109   :  { %v981_v32 = vunpack.c.l.b16 %v433_v26 }
 0x10c   :  { %1386 = vmatpush.bf16.msrb.mxu3 %v5060_v19  ;;  %v5086_v19 = vld [vmem:[#allocation5 + $0xa0] sm:$0xff] }
 0x10e   :  { %v403_v27 = vpop.f32.mrf.mxu1 }
 0x10f   :  { %v434_v28 = vpack.c.bf16 %v403_v27, %v403_v27 }
 0x110   :  { %1387 = vmatpush.bf16.msrb.mxu3 %v5059_v22 }
 0x111   :  { %v982_v33 = vunpack.c.l.b16 %v434_v28  ;;  %v277_v28 = vadd.f32 %v5277_v25, %v276_v62  ;;  %v5095_v25 = vld [vmem:[#allocation5 + $0xe8] sm:$0xff] }
 0x113   :  { %v983_v34 = vpack.c.b16 %v982_v33, %v981_v32 }
 0x114   :  { %1388 = vmatpush.bf16.msrb.mxu3 %v5058_v24  ;;  %v5096_v24 = vld [vmem:[#allocation5 + $0xf0] sm:$0xff] }
 0x115   :  { %1041 = vmatmul.bf16.vlgmr.msra.gmra.mxu2 %v983_v34 }
 0x116   :  { %v406_v36 = vpop.f32.mrf.mxu1  ;;  %1544 = vmatpush.bf16.msra.mxu2 %v5073_v0 }
 0x117   :  { %v435_v39 = vpack.c.bf16 %v406_v36, %v406_v36 }
 0x119   :  { %v1068_v44 = vunpack.c.l.b16 %v435_v39 }
 0x11a   :  { %1545 = vmatpush.bf16.msra.mxu2 %v5072_v7  ;;  %v5121_v7 = vld [vmem:[#allocation5 + $0x1b8] sm:$0xff] }
 0x11e   :  { %v408_v41 = vpop.f32.mrf.mxu1 }
 0x11f   :  { %v436_v42 = vpack.c.bf16 %v408_v41, %v408_v41 }
 0x121   :  { %v1069_v45 = vunpack.c.l.b16 %v436_v42 }
 0x123   :  { %v1070_v46 = vpack.c.b16 %v1069_v45, %v1068_v44 }
 0x125   :  { %1128 = vmatmul.bf16.vlgmr.msra.gmra.mxu3 %v1070_v46 }
 0x126   :  { %v411_v47 = vpop.f32.mrf.mxu1 }
 0x127   :  { %v437_v48 = vpack.c.bf16 %v411_v47, %v411_v47 }
 0x129   :  { %v1155_v51 = vunpack.c.l.b16 %v437_v48 }
 0x12e   :  { %v413_v49 = vpop.f32.mrf.mxu1 }
 0x12f   :  { %v438_v50 = vpack.c.bf16 %v413_v49, %v413_v49 }
 0x131   :  { %v1156_v52 = vunpack.c.l.b16 %v438_v50 }
 0x133   :  { %v1157_v53 = vpack.c.b16 %v1156_v52, %v1155_v51 }
 0x135   :  { %1215 = vmatmul.bf16.vlgmr.msrb.gmra.mxu0 %v1157_v53 }
 0x136   :  { %v416_v54 = vpop.f32.mrf.mxu1 }
 0x137   :  { %v439_v55 = vpack.c.bf16 %v416_v54, %v416_v54 }
 0x138   :  { %v520_v63 = vpop.f32.mrf.mxu2 }
 0x139   :  { %v1242_v59 = vunpack.c.l.b16 %v439_v55  ;;  %v525_v32 = vadd.f32 %v520_v63, %v277_v28 }
 0x13e   :  { %v418_v57 = vpop.f32.mrf.mxu1 }
 0x13f   :  { %v440_v58 = vpack.c.bf16 %v418_v57, %v418_v57 }
 0x140   :  { %v522_v8 = vpop.f32.mrf.mxu2 }
 0x141   :  { %v1243_v60 = vunpack.c.l.b16 %v440_v58  ;;  %v526_v33 = vadd.f32 %v522_v8, %v279_v30  ;;  %v5081_v8 = vld [vmem:[#allocation5 + $0x78] sm:$0xff]  ;;  %v5094_v30 = vld [vmem:[#allocation5 + $0xe0] sm:$0xff] }
 0x142   :  { %1631 = vmatpush.bf16.msra.mxu3 %v5081_v8  ;;  %v5107_v8 = vld [vmem:[#allocation5 + $0x148] sm:$0xff] }
 0x143   :  { %v1244_v61 = vpack.c.b16 %v1243_v60, %v1242_v59 }
 0x145   :  { %1302 = vmatmul.bf16.vlgmr.msrb.gmra.mxu2 %v1244_v61 }
 0x148   :  { %v607_v10 = vpop.f32.mrf.mxu3 }
 0x149   :  { %v612_v34 = vadd.f32 %v607_v10, %v525_v32  ;;  %v5080_v10 = vld [vmem:[#allocation5 + $0x70] sm:$0xff] }
 0x14a   :  { %1632 = vmatpush.bf16.msra.mxu3 %v5080_v10 }
 0x150   :  { %v609_v15 = vpop.f32.mrf.mxu3 }
 0x151   :  { %v613_v37 = vadd.f32 %v609_v15, %v526_v33  ;;  %v5076_v15 = vld [vmem:[#allocation5 + $0x50] sm:$0xff] }
 0x152   :  { %v694_v12 = vpop.f32.mrf.mxu0 }
 0x153   :  { %v699_v38 = vadd.f32 %v694_v12, %v612_v34  ;;  %v5066_v12 = vld [vmem:[#allocation5] sm:$0xff] }
 0x15a   :  { %v696_v17 = vpop.f32.mrf.mxu0 }
 0x15b   :  { %v700_v41 = vadd.f32 %v696_v17, %v613_v37  ;;  %v5074_v17 = vld [vmem:[#allocation5 + $0x40] sm:$0xff]  ;;  %v5092_v37 = vld [vmem:[#allocation5 + $0xd0] sm:$0xff] }
 0x168   :  { %v781_v14 = vpop.f32.mrf.mxu2 }
 0x169   :  { %v786_v42 = vadd.f32 %v781_v14, %v699_v38  ;;  %v5077_v14 = vld [vmem:[#allocation5 + $0x58] sm:$0xff]  ;;  %v5104_v38 = vld [vmem:[#allocation5 + $0x130] sm:$0xff] }
 0x170   :  { %v783_v20 = vpop.f32.mrf.mxu2 }
 0x171   :  { %v787_v43 = vadd.f32 %v783_v20, %v700_v41  ;;  %v5085_v20 = vld [vmem:[#allocation5 + $0x98] sm:$0xff]  ;;  %v5103_v41 = vld [vmem:[#allocation5 + $0x128] sm:$0xff] }
 0x178   :  { %v868_v21 = vpop.f32.mrf.mxu3 }
 0x179   :  { %v873_v44 = vadd.f32 %v868_v21, %v786_v42  ;;  %v5097_v21 = vld [vmem:[#allocation5 + $0xf8] sm:$0xff] }
 0x180   :  { %v870_v27 = vpop.f32.mrf.mxu3 }
 0x181   :  { %v874_v45 = vadd.f32 %v870_v27, %v787_v43 }
 0x182   :  { %v955_v23 = vpop.f32.mrf.mxu0 }
 0x183   :  { %v960_v46 = vadd.f32 %v955_v23, %v873_v44  ;;  %v5084_v23 = vld [vmem:[#allocation5 + $0x90] sm:$0xff] }
 0x18a   :  { %v957_v29 = vpop.f32.mrf.mxu0 }
 0x18b   :  { %v961_v48 = vadd.f32 %v957_v29, %v874_v45  ;;  %v5082_v29 = vld [vmem:[#allocation5 + $0x80] sm:$0xff] }
 0x18c   :  { %v5090_v45 = vld [vmem:[#allocation5 + $0xc0] sm:$0xff] }
 0x198   :  { %v1042_v26 = vpop.f32.mrf.mxu2 }
 0x199   :  { %v1047_v49 = vadd.f32 %v1042_v26, %v960_v46  ;;  %v5102_v46 = vld [vmem:[#allocation5 + $0x120] sm:$0xff] }
 0x1a0   :  { %v1044_v35 = vpop.f32.mrf.mxu2 }
 0x1a1   :  { %v1048_v51 = vadd.f32 %v1044_v35, %v961_v48  ;;  %v5093_v35 = vld [vmem:[#allocation5 + $0xd8] sm:$0xff] }
 0x1a8   :  { %v1129_v36 = vpop.f32.mrf.mxu3 }
 0x1a9   :  { %v1134_v52 = vadd.f32 %v1129_v36, %v1047_v49  ;;  %v5105_v36 = vld [vmem:[#allocation5 + $0x138] sm:$0xff] }
 0x1b0   :  { %v1131_v50 = vpop.f32.mrf.mxu3 }
 0x1b1   :  { %v1135_v54 = vadd.f32 %v1131_v50, %v1048_v51  ;;  %v5101_v50 = vld [vmem:[#allocation5 + $0x118] sm:$0xff] }
 0x1b2   :  { %v1216_v39 = vpop.f32.mrf.mxu0  ;;  %v5113_v51 = vld [vmem:[#allocation5 + $0x178] sm:$0xff] }
 0x1b3   :  { %v1221_v55 = vadd.f32 %v1216_v39, %v1134_v52  ;;  %v5091_v39 = vld [vmem:[#allocation5 + $0xc8] sm:$0xff]  ;;  %v5100_v52 = vld [vmem:[#allocation5 + $0x110] sm:$0xff] }
 0x1ba   :  { %v1218_v53 = vpop.f32.mrf.mxu0 }
 0x1bb   :  { %v1222_v57 = vadd.f32 %v1218_v53, %v1135_v54  ;;  %v5112_v53 = vld [vmem:[#allocation5 + $0x170] sm:$0xff]  ;;  %v5099_v54 = vld [vmem:[#allocation5 + $0x108] sm:$0xff] }
 0x1c8   :  { %v1303_v47 = vpop.f32.mrf.mxu2 }
 0x1c9   :  { %v1308_v58 = vadd.f32 %v1303_v47, %v1221_v55  ;;  %v5111_v55 = vld [vmem:[#allocation5 + $0x168] sm:$0xff] }
 0x1cb   :  { %v1310_v61 = vmax.f32 %v1308_v58, 0.0 }
 0x1d0   :  { %v1305_v59 = vpop.f32.mrf.mxu2 }
 0x1d1   :  { %v1309_v60 = vadd.f32 %v1305_v59, %v1222_v57 }
 0x1d3   :  { %v1311_v62 = vmax.f32 %v1309_v60, 0.0  ;;  %v5098_v60 = vld [vmem:[#allocation5 + $0x100] sm:$0xff] }
 0x1d5   :  { %v1312_v63 = vpack.c.bf16 %v1311_v62, %v1310_v61  ;;  %v5110_v61 = vld [vmem:[#allocation5 + $0x160] sm:$0xff] }
 0x1d7   :  { %1389 = vmatmul.bf16.vlgmr.msrb.gmra.mxu3 %v1312_v63  ;;  %1402 = vmatpush.bf16.msra.mxu0 %v1312_v63 }
 0x1da   :  { %4137 = vmatmul.msk.bf16.vlgmr.msra.gmra.mxu0 %vm331_vm0, %v5618_v2  ;;  %v5071_v2 = vld [vmem:[#allocation5 + $0x28] sm:$0xff] }
 0x1db   :  { %1546 = vmatpush.bf16.msra.mxu2 %v5071_v2 }
 0x1ea   :  { %4138 = vmatmul.msk.bf16.gmra.mxu0 %vm331_vm0, %v5625_v3  ;;  %v5070_v3 = vld [vmem:[#allocation5 + $0x20] sm:$0xff] }
 0x1eb   :  { %1547 = vmatpush.bf16.msra.mxu2 %v5070_v3  ;;  %v5108_v3 = vld [vmem:[#allocation5 + $0x150] sm:$0xff] }
 0x1fa   :  { %4139 = vmatmul.msk.bf16.gmra.mxu0 %vm331_vm0, %v5632_v4  ;;  %v5069_v4 = vld [vmem:[#allocation5 + $0x18] sm:$0xff] }
 0x1fb   :  { %1548 = vmatpush.bf16.msra.mxu2 %v5069_v4  ;;  %v5120_v4 = vld [vmem:[#allocation5 + $0x1b0] sm:$0xff] }
 0x20a   :  { %4140 = vmatmul.msk.bf16.gmra.mxu0 %vm331_vm0, %v5639_v5  ;;  %v5068_v5 = vld [vmem:[#allocation5 + $0x10] sm:$0xff] }
 0x20b   :  { %1549 = vmatpush.bf16.msra.mxu2 %v5068_v5  ;;  %v5119_v5 = vld [vmem:[#allocation5 + $0x1a8] sm:$0xff] }
 0x20f   :  { %1550 = vmatpush.bf16.msra.mxu2 %v5067_v11 }
 0x213   :  { %1551 = vmatpush.bf16.msra.mxu2 %v5066_v12  ;;  %v5118_v12 = vld [vmem:[#allocation5 + $0x1a0] sm:$0xff] }
 0x217   :  { %1805 = vmatpush.bf16.msrb.mxu2 %v5097_v21  ;;  %v5115_v21 = vld [vmem:[#allocation5 + $0x188] sm:$0xff] }
 0x21a   :  { %4141 = vmatmul.msk.bf16.gmra.mxu0 %vm331_vm0, %v5646_v6  ;;  %v5088_v6 = vld [vmem:[#allocation5 + $0xb0] sm:$0xff] }
 0x21b   :  { %1719 = vmatpush.bf16.msrb.mxu1 %v5088_v6  ;;  %1806 = vmatpush.bf16.msrb.mxu2 %v5096_v24 }
 0x21f   :  { %1720 = vmatpush.bf16.msrb.mxu1 %v5087_v16  ;;  %1807 = vmatpush.bf16.msrb.mxu2 %v5095_v25  ;;  %v5129_v16 = vld [vmem:[#allocation5 + $0x1f8] sm:$0xff]  ;;  %v5114_v25 = vld [vmem:[#allocation5 + $0x180] sm:$0xff] }
 0x223   :  { %1721 = vmatpush.bf16.msrb.mxu1 %v5086_v19  ;;  %1808 = vmatpush.bf16.msrb.mxu2 %v5094_v30  ;;  %v5116_v19 = vld [vmem:[#allocation5 + $0x190] sm:$0xff]  ;;  %v5125_v30 = vld [vmem:[#allocation5 + $0x1d8] sm:$0xff] }
 0x227   :  { %1722 = vmatpush.bf16.msrb.mxu1 %v5085_v20  ;;  %1809 = vmatpush.bf16.msrb.mxu2 %v5093_v35  ;;  %v5128_v20 = vld [vmem:[#allocation5 + $0x1f0] sm:$0xff] }
 0x228   :  { %v5136_v35 = vld [vmem:[#allocation5 + $0x230] sm:$0xff] }
 0x22a   :  { %4142 = vmatmul.msk.bf16.gmra.mxu0 %vm331_vm0, %v5656_v9  ;;  %v5079_v9 = vld [vmem:[#allocation5 + $0x68] sm:$0xff] }
 0x22b   :  { %1633 = vmatpush.bf16.msra.mxu3 %v5079_v9  ;;  %1723 = vmatpush.bf16.msrb.mxu1 %v5084_v23  ;;  %v5106_v9 = vld [vmem:[#allocation5 + $0x140] sm:$0xff] }
 0x22c   :  { %1810 = vmatpush.bf16.msrb.mxu2 %v5092_v37 }
 0x22f   :  { %1634 = vmatpush.bf16.msra.mxu3 %v5078_v13 }
 0x230   :  { %1811 = vmatpush.bf16.msrb.mxu2 %v5091_v39 }
 0x233   :  { %1635 = vmatpush.bf16.msra.mxu3 %v5077_v14 }
 0x234   :  { %1812 = vmatpush.bf16.msrb.mxu2 %v5090_v45 }
 0x237   :  { %1636 = vmatpush.bf16.msra.mxu3 %v5076_v15 }
 0x23a   :  { %4143 = vmatmul.msk.bf16.gmra.mxu0 %vm331_vm0, %v5672_v18  ;;  %v5075_v18 = vld [vmem:[#allocation5 + $0x48] sm:$0xff] }
 0x23b   :  { %1637 = vmatpush.bf16.msra.mxu3 %v5075_v18  ;;  %v5117_v18 = vld [vmem:[#allocation5 + $0x198] sm:$0xff] }
 0x23f   :  { %1638 = vmatpush.bf16.msra.mxu3 %v5074_v17 }
 0x243   :  { %1892 = vmatpush.bf16.msrb.mxu3 %v5105_v36  ;;  %v5123_v36 = vld [vmem:[#allocation5 + $0x1c8] sm:$0xff] }
 0x247   :  { %1893 = vmatpush.bf16.msrb.mxu3 %v5104_v38 }
 0x24a   :  { %4144 = vmatmul.msk.bf16.gmra.mxu0 %vm331_vm0, %v5691_v31  ;;  %v5083_v31 = vld [vmem:[#allocation5 + $0x88] sm:$0xff] }
 0x24b   :  { %1724 = vmatpush.bf16.msrb.mxu1 %v5083_v31  ;;  %1894 = vmatpush.bf16.msrb.mxu3 %v5103_v41  ;;  %v5122_v41 = vld [vmem:[#allocation5 + $0x1c0] sm:$0xff] }
 0x24f   :  { %1725 = vmatpush.bf16.msrb.mxu1 %v5082_v29  ;;  %1895 = vmatpush.bf16.msrb.mxu3 %v5102_v46  ;;  %v5133_v46 = vld [vmem:[#allocation5 + $0x218] sm:$0xff] }
 0x253   :  { %1896 = vmatpush.bf16.msrb.mxu3 %v5101_v50  ;;  %1979 = vmatpush.bf16.msra.mxu1 %v5113_v51  ;;  %v5144_v50 = vld [vmem:[#allocation5 + $0x270] sm:$0xff]  ;;  %v5131_v51 = vld [vmem:[#allocation5 + $0x208] sm:$0xff] }
 0x257   :  { %v1404_v22 = vpop.f32.mrf.mxu0  ;;  %1897 = vmatpush.bf16.msrb.mxu3 %v5100_v52  ;;  %1980 = vmatpush.bf16.msra.mxu1 %v5112_v53 }
 0x258   :  { %v1454_v26 = vpack.c.bf16 %v1404_v22, %v1404_v22  ;;  %v5127_v22 = vld [vmem:[#allocation5 + $0x1e8] sm:$0xff] }
 0x25a   :  { %4145 = vmatmul.msk.bf16.gmra.mxu0 %vm331_vm0, %v5698_v40  ;;  %v1492_v32 = vunpack.c.l.b16 %v1454_v26  ;;  %v5126_v26 = vld [vmem:[#allocation5 + $0x1e0] sm:$0xff] }
 0x25b   :  { %1898 = vmatpush.bf16.msrb.mxu3 %v5099_v54  ;;  %1981 = vmatpush.bf16.msra.mxu1 %v5111_v55  ;;  %v5130_v55 = vld [vmem:[#allocation5 + $0x200] sm:$0xff] }
 0x25f   :  { %v1406_v27 = vpop.f32.mrf.mxu0  ;;  %1899 = vmatpush.bf16.msrb.mxu3 %v5098_v60  ;;  %1982 = vmatpush.bf16.msra.mxu1 %v5110_v61  ;;  %v5141_v61 = vld [vmem:[#allocation5 + $0x258] sm:$0xff] }
 0x260   :  { %v1455_v28 = vpack.c.bf16 %v1406_v27, %v1406_v27 }
 0x262   :  { %v1493_v33 = vunpack.c.l.b16 %v1455_v28 }
 0x263   :  { %1983 = vmatpush.bf16.msra.mxu1 %v5109_v1 }
 0x264   :  { %v1494_v34 = vpack.c.b16 %v1493_v33, %v1492_v32  ;;  %v5137_v32 = vld [vmem:[#allocation5 + $0x238] sm:$0xff] }
 0x266   :  { %1552 = vmatmul.bf16.vlgmr.msra.gmra.mxu2 %v1494_v34  ;;  %v5124_v34 = vld [vmem:[#allocation5 + $0x1d0] sm:$0xff] }
 0x267   :  { %v1409_v40 = vpop.f32.mrf.mxu0  ;;  %2066 = vmatpush.bf16.msra.mxu2 %v5121_v7  ;;  %1984 = vmatpush.bf16.msra.mxu1 %v5108_v3  ;;  %v5138_v3 = vld [vmem:[#allocation5 + $0x240] sm:$0xff] }
 0x268   :  { %v1456_v42 = vpack.c.bf16 %v1409_v40, %v1409_v40  ;;  %v5135_v40 = vld [vmem:[#allocation5 + $0x228] sm:$0xff] }
 0x26a   :  { %4146 = vmatmul.msk.bf16.gmra.mxu0 %vm331_vm0, %v5705_v56  ;;  %v1579_v47 = vunpack.c.l.b16 %v1456_v42  ;;  %v5134_v42 = vld [vmem:[#allocation5 + $0x220] sm:$0xff] }
 0x26b   :  { %2067 = vmatpush.bf16.msra.mxu2 %v5120_v4  ;;  %1985 = vmatpush.bf16.msra.mxu1 %v5107_v8 }
 0x26f   :  { %v1411_v43 = vpop.f32.mrf.mxu0  ;;  %2068 = vmatpush.bf16.msra.mxu2 %v5119_v5  ;;  %1986 = vmatpush.bf16.msra.mxu1 %v5106_v9 }
 0x270   :  { %v1457_v44 = vpack.c.bf16 %v1411_v43, %v1411_v43 }
 0x272   :  { %v1580_v48 = vunpack.c.l.b16 %v1457_v44 }
 0x273   :  { %2069 = vmatpush.bf16.msra.mxu2 %v5118_v12 }
 0x274   :  { %v1581_v49 = vpack.c.b16 %v1580_v48, %v1579_v47  ;;  %v5145_v47 = vld [vmem:[#allocation5 + $0x278] sm:$0xff] }
 0x276   :  { %1639 = vmatmul.bf16.vlgmr.msra.gmra.mxu3 %v1581_v49  ;;  %v5132_v49 = vld [vmem:[#allocation5 + $0x210] sm:$0xff] }
 0x277   :  { %v1414_v56 = vpop.f32.mrf.mxu0  ;;  %2070 = vmatpush.bf16.msra.mxu2 %v5117_v18  ;;  %2153 = vmatpush.bf16.msra.mxu3 %v5129_v16 }
 0x278   :  { %v1458_v57 = vpack.c.bf16 %v1414_v56, %v1414_v56  ;;  %v5143_v56 = vld [vmem:[#allocation5 + $0x268] sm:$0xff] }
 0x27a   :  { %v1666_v62 = vunpack.c.l.b16 %v1458_v57  ;;  %v5142_v57 = vld [vmem:[#allocation5 + $0x260] sm:$0xff] }
 0x27b   :  { %2071 = vmatpush.bf16.msra.mxu2 %v5116_v19  ;;  %2154 = vmatpush.bf16.msra.mxu3 %v5128_v20 }
 0x27f   :  { %v1416_v58 = vpop.f32.mrf.mxu0  ;;  %2072 = vmatpush.bf16.msra.mxu2 %v5115_v21  ;;  %2155 = vmatpush.bf16.msra.mxu3 %v5127_v22  ;;  %v1390_v22 = vpop.f32.mrf.mxu3 }
 0x280   :  { %v1459_v59 = vpack.c.bf16 %v1416_v58, %v1416_v58 }
 0x282   :  { %v1667_v63 = vunpack.c.l.b16 %v1459_v59 }
 0x283   :  { %2073 = vmatpush.bf16.msra.mxu2 %v5114_v25  ;;  %2156 = vmatpush.bf16.msra.mxu3 %v5126_v26  ;;  %v5152_v25 = vld [vmem:[#allocation10 + $0x30] sm:$0xff] }
 0x284   :  { %v1668_v0 = vpack.c.b16 %v1667_v63, %v1666_v62  ;;  %v5140_v63 = vld [vmem:[#allocation5 + $0x250] sm:$0xff] }
 0x286   :  { %1726 = vmatmul.bf16.vlgmr.msrb.gmra.mxu1 %v1668_v0  ;;  %v5139_v0 = vld [vmem:[#allocation5 + $0x248] sm:$0xff] }
 0x287   :  { %v1419_v2 = vpop.f32.mrf.mxu0  ;;  %2157 = vmatpush.bf16.msra.mxu3 %v5125_v30  ;;  %2240 = vmatpush.bf16.msrb.mxu1 %v5137_v32  ;;  %v5150_v30 = vld [vmem:[#allocation10 + $0x20] sm:$0xff] }
 0x288   :  { %v1460_v10 = vpack.c.bf16 %v1419_v2, %v1419_v2 }
 0x28a   :  { %v1753_v13 = vunpack.c.l.b16 %v1460_v10 }
 0x28b   :  { %2158 = vmatpush.bf16.msra.mxu3 %v5124_v34  ;;  %2241 = vmatpush.bf16.msrb.mxu1 %v5136_v35  ;;  %v5149_v34 = vld [vmem:[#allocation10 + $0x18] sm:$0xff] }
 0x28f   :  { %v1421_v6 = vpop.f32.mrf.mxu0  ;;  %2159 = vmatpush.bf16.msra.mxu3 %v5123_v36  ;;  %2242 = vmatpush.bf16.msrb.mxu1 %v5135_v40  ;;  %v5148_v36 = vld [vmem:[#allocation10 + $0x10] sm:$0xff] }
 0x290   :  { %v1461_v11 = vpack.c.bf16 %v1421_v6, %v1421_v6 }
 0x292   :  { %v1754_v14 = vunpack.c.l.b16 %v1461_v11 }
 0x293   :  { %2160 = vmatpush.bf16.msra.mxu3 %v5122_v41  ;;  %2243 = vmatpush.bf16.msrb.mxu1 %v5134_v42  ;;  %v5146_v41 = vld [vmem:[#allocation10] sm:$0xff] }
 0x294   :  { %v1755_v15 = vpack.c.b16 %v1754_v14, %v1753_v13 }
 0x296   :  { %1813 = vmatmul.bf16.vlgmr.msrb.gmra.mxu2 %v1755_v15 }
 0x297   :  { %v1424_v17 = vpop.f32.mrf.mxu0  ;;  %2244 = vmatpush.bf16.msrb.mxu1 %v5133_v46  ;;  %2327 = vmatpush.bf16.msrb.mxu2 %v5145_v47 }
 0x298   :  { %v1462_v23 = vpack.c.bf16 %v1424_v17, %v1424_v17 }
 0x29a   :  { %v1840_v27 = vunpack.c.l.b16 %v1462_v23 }
 0x29b   :  { %2245 = vmatpush.bf16.msrb.mxu1 %v5132_v49  ;;  %2328 = vmatpush.bf16.msrb.mxu2 %v5144_v50 }
 0x29f   :  { %v1426_v24 = vpop.f32.mrf.mxu0  ;;  %2246 = vmatpush.bf16.msrb.mxu1 %v5131_v51  ;;  %2329 = vmatpush.bf16.msrb.mxu2 %v5143_v56 }
 0x2a0   :  { %v1463_v31 = vpack.c.bf16 %v1426_v24, %v1426_v24  ;;  %v5153_v24 = vld [vmem:[#allocation10 + $0x38] sm:$0xff] }
 0x2a2   :  { %v1841_v28 = vunpack.c.l.b16 %v1463_v31  ;;  %v1392_v31 = vpop.f32.mrf.mxu3 }
 0x2a3   :  { %2247 = vmatpush.bf16.msrb.mxu1 %v5130_v55  ;;  %2330 = vmatpush.bf16.msrb.mxu2 %v5142_v57 }
 0x2a4   :  { %v1842_v29 = vpack.c.b16 %v1841_v28, %v1840_v27  ;;  %v5151_v28 = vld [vmem:[#allocation10 + $0x28] sm:$0xff] }
 0x2a6   :  { %1900 = vmatmul.bf16.vlgmr.msrb.gmra.mxu3 %v1842_v29 }
 0x2a7   :  { %v1429_v33 = vpop.f32.mrf.mxu0  ;;  %2331 = vmatpush.bf16.msrb.mxu2 %v5141_v61  ;;  %2414 = vmatpush.bf16.msrb.mxu3 %v5153_v24  ;;  %v5158_v24 = vld [vmem:[#allocation8 + $0x20] sm:$0xff] }
 0x2a8   :  { %v1464_v37 = vpack.c.bf16 %v1429_v33, %v1429_v33 }
 0x2aa   :  { %v1927_v43 = vunpack.c.l.b16 %v1464_v37 }
 0x2ab   :  { %2332 = vmatpush.bf16.msrb.mxu2 %v5140_v63  ;;  %2415 = vmatpush.bf16.msrb.mxu3 %v5152_v25  ;;  %v5169_v25 = vld [vmem:[#allocation8 + $0x78] sm:$0xff] }
 0x2af   :  { %v1431_v38 = vpop.f32.mrf.mxu0  ;;  %2333 = vmatpush.bf16.msrb.mxu2 %v5139_v0  ;;  %2416 = vmatpush.bf16.msrb.mxu3 %v5151_v28  ;;  %v5287_v28 = vld [vmem:[%s5818_s2 + $0x30] sm:$0xff] }
 0x2b0   :  { %v1465_v39 = vpack.c.bf16 %v1431_v38, %v1431_v38  ;;  %v5147_v38 = vld [vmem:[#allocation10 + $0x8] sm:$0xff] }
 0x2b2   :  { %v1928_v44 = vunpack.c.l.b16 %v1465_v39 }
 0x2b3   :  { %2334 = vmatpush.bf16.msrb.mxu2 %v5138_v3  ;;  %2417 = vmatpush.bf16.msrb.mxu3 %v5150_v30  ;;  %v5155_v30 = vld [vmem:[#allocation8 + $0x8] sm:$0xff] }
 0x2b4   :  { %v1929_v45 = vpack.c.b16 %v1928_v44, %v1927_v43  ;;  %v5278_v43 = vld [vmem:[%s5804_s9] ss:$0 sm:$0xff] }
 0x2b5   :  { %v1391_v46 = vadd.f32 %v5278_v43, %v1390_v22  ;;  %v1393_v47 = vadd.f32 %v5278_v43, %v1392_v31  ;;  %v5286_v22 = vld [vmem:[%s5818_s2 + $0x28] sm:$0xff]  ;;  %v5157_v31 = vld [vmem:[#allocation8 + $0x18] sm:$0xff] }
 0x2b6   :  { %1987 = vmatmul.bf16.vlgmr.msra.gmra.mxu1 %v1929_v45  ;;  %v5185_v43 = vld [vmem:[#allocation8 + $0xf8] sm:$0xff] }
 0x2b7   :  { %v1434_v48 = vpop.f32.mrf.mxu0  ;;  %2418 = vmatpush.bf16.msrb.mxu3 %v5149_v34  ;;  %v5166_v34 = vld [vmem:[#allocation8 + $0x60] sm:$0xff] }
 0x2b8   :  { %v1466_v52 = vpack.c.bf16 %v1434_v48, %v1434_v48 }
 0x2ba   :  { %v2014_v58 = vunpack.c.l.b16 %v1466_v52 }
 0x2bb   :  { %2419 = vmatpush.bf16.msrb.mxu3 %v5148_v36  ;;  %v5164_v36 = vld [vmem:[#allocation8 + $0x50] sm:$0xff] }
 0x2bf   :  { %v1436_v53 = vpop.f32.mrf.mxu0  ;;  %2420 = vmatpush.bf16.msrb.mxu3 %v5147_v38  ;;  %v5175_v38 = vld [vmem:[#allocation8 + $0xa8] sm:$0xff] }
 0x2c0   :  { %v1467_v54 = vpack.c.bf16 %v1436_v53, %v1436_v53 }
 0x2c2   :  { %v2015_v59 = vunpack.c.l.b16 %v1467_v54 }
 0x2c3   :  { %2421 = vmatpush.bf16.msrb.mxu3 %v5146_v41  ;;  %v5174_v41 = vld [vmem:[#allocation8 + $0xa0] sm:$0xff] }
 0x2c4   :  { %v2016_v60 = vpack.c.b16 %v2015_v59, %v2014_v58 }
 0x2c6   :  { %2074 = vmatmul.bf16.vlgmr.msra.gmra.mxu2 %v2016_v60 }
 0x2c7   :  { %v1439_v62 = vpop.f32.mrf.mxu0 }
 0x2c8   :  { %v1468_v1 = vpack.c.bf16 %v1439_v62, %v1439_v62 }
 0x2ca   :  { %v2101_v4 = vunpack.c.l.b16 %v1468_v1 }
 0x2cf   :  { %v1441_v7 = vpop.f32.mrf.mxu0 }
 0x2d0   :  { %v1469_v2 = vpack.c.bf16 %v1441_v7, %v1441_v7 }
 0x2d2   :  { %v2102_v8 = vunpack.c.l.b16 %v1469_v2 }
 0x2d4   :  { %v2103_v5 = vpack.c.b16 %v2102_v8, %v2101_v4 }
 0x2d6   :  { %2161 = vmatmul.bf16.vlgmr.msra.gmra.mxu3 %v2103_v5 }
 0x2d7   :  { %v1444_v10 = vpop.f32.mrf.mxu0  ;;  %2664 = vmatpush.bf16.msra.mxu3 %v5169_v25  ;;  %v5209_v25 = vld [vmem:[#allocation8 + $0x1b8] sm:$0xff] }
 0x2d8   :  { %v1470_v6 = vpack.c.bf16 %v1444_v10, %v1444_v10 }
 0x2da   :  { %v2188_v12 = vunpack.c.l.b16 %v1470_v6 }
 0x2df   :  { %v1446_v11 = vpop.f32.mrf.mxu0 }
 0x2e0   :  { %v1471_v9 = vpack.c.bf16 %v1446_v11, %v1446_v11 }
 0x2e2   :  { %v2189_v13 = vunpack.c.l.b16 %v1471_v9 }
 0x2e4   :  { %v2190_v14 = vpack.c.b16 %v2189_v13, %v2188_v12 }
 0x2e6   :  { %2248 = vmatmul.bf16.vlgmr.msrb.gmra.mxu1 %v2190_v14  ;;  %v5281_v14 = vld [vmem:[%s5818_s2] sm:$0xff] }
 0x2e7   :  { %v1449_v15 = vpop.f32.mrf.mxu0 }
 0x2e8   :  { %v1472_v18 = vpack.c.bf16 %v1449_v15, %v1449_v15  ;;  %v5282_v15 = vld [vmem:[%s5818_s2 + $0x8] sm:$0xff] }
 0x2e9   :  { %v1553_v23 = vpop.f32.mrf.mxu2 }
 0x2ea   :  { %v2275_v19 = vunpack.c.l.b16 %v1472_v18  ;;  %v1558_v48 = vadd.f32 %v1553_v23, %v1391_v46  ;;  %v5283_v18 = vld [vmem:[%s5818_s2 + $0x10] sm:$0xff] }
 0x2eb   :  { %v5159_v23 = vld [vmem:[#allocation8 + $0x28] sm:$0xff]  ;;  %v5184_v46 = vld [vmem:[#allocation8 + $0xf0] sm:$0xff] }
 0x2ef   :  { %v1451_v16 = vpop.f32.mrf.mxu0 }
 0x2f0   :  { %v1473_v17 = vpack.c.bf16 %v1451_v16, %v1451_v16  ;;  %v5284_v16 = vld [vmem:[%s5818_s2 + $0x18] sm:$0xff] }
 0x2f1   :  { %v1555_v26 = vpop.f32.mrf.mxu2 }
 0x2f2   :  { %v2276_v20 = vunpack.c.l.b16 %v1473_v17  ;;  %v1559_v49 = vadd.f32 %v1555_v26, %v1393_v47  ;;  %v5285_v17 = vld [vmem:[%s5818_s2 + $0x20] sm:$0xff]  ;;  %v5156_v26 = vld [vmem:[#allocation8 + $0x10] sm:$0xff] }
 0x2f3   :  { %v5289_v47 = vld [vmem:[%s5818_s2 + $0x40] sm:$0xff] }
 0x2f4   :  { %v2277_v21 = vpack.c.b16 %v2276_v20, %v2275_v19  ;;  %v5161_v19 = vld [vmem:[#allocation8 + $0x38] sm:$0xff] }
 0x2f5   :  { %v5177_v20 = vld [vmem:[#allocation8 + $0xb8] sm:$0xff]  ;;  %2577 = vmatpush.bf16.msra.mxu2 %v5161_v19 }
 0x2f6   :  { %2335 = vmatmul.bf16.vlgmr.msrb.gmra.mxu2 %v2277_v21  ;;  %2751 = vmatpush.bf16.msrb.mxu0 %v5177_v20  ;;  %v5160_v21 = vld [vmem:[#allocation8 + $0x30] sm:$0xff]  ;;  %v5186_v20 = vld [vmem:[#allocation8 + $0x100] sm:$0xff] }
 0x2f9   :  { %v1640_v27 = vpop.f32.mrf.mxu3  ;;  %2578 = vmatpush.bf16.msra.mxu2 %v5160_v21  ;;  %v5198_v21 = vld [vmem:[#allocation8 + $0x160] sm:$0xff] }
 0x2fa   :  { %v1645_v50 = vadd.f32 %v1640_v27, %v1558_v48  ;;  %v5168_v27 = vld [vmem:[#allocation8 + $0x70] sm:$0xff]  ;;  %v5171_v48 = vld [vmem:[#allocation8 + $0x88] sm:$0xff] }
 0x2fb   :  { %2665 = vmatpush.bf16.msra.mxu3 %v5168_v27  ;;  %v5196_v27 = vld [vmem:[#allocation8 + $0x150] sm:$0xff] }
 0x2fd   :  { %2579 = vmatpush.bf16.msra.mxu2 %v5159_v23 }
 0x301   :  { %v1642_v33 = vpop.f32.mrf.mxu3  ;;  %2580 = vmatpush.bf16.msra.mxu2 %v5158_v24 }
 0x302   :  { %v1646_v52 = vadd.f32 %v1642_v33, %v1559_v49  ;;  %v5154_v33 = vld [vmem:[#allocation8] sm:$0xff]  ;;  %v5183_v49 = vld [vmem:[#allocation8 + $0xe8] sm:$0xff] }
 0x303   :  { %v1727_v29 = vpop.f32.mrf.mxu1 }
 0x304   :  { %v1732_v53 = vadd.f32 %v1727_v29, %v1645_v50  ;;  %v5176_v29 = vld [vmem:[#allocation8 + $0xb0] sm:$0xff] }
 0x305   :  { %2581 = vmatpush.bf16.msra.mxu2 %v5157_v31  ;;  %2752 = vmatpush.bf16.msrb.mxu0 %v5176_v29  ;;  %v5197_v31 = vld [vmem:[#allocation8 + $0x158] sm:$0xff]  ;;  %v5195_v29 = vld [vmem:[#allocation8 + $0x148] sm:$0xff] }
 0x309   :  { %2582 = vmatpush.bf16.msra.mxu2 %v5156_v26  ;;  %2753 = vmatpush.bf16.msrb.mxu0 %v5175_v38 }
 0x30b   :  { %v1729_v35 = vpop.f32.mrf.mxu1 }
 0x30c   :  { %v1733_v55 = vadd.f32 %v1729_v35, %v1646_v52  ;;  %v5165_v35 = vld [vmem:[#allocation8 + $0x58] sm:$0xff]  ;;  %v5170_v52 = vld [vmem:[#allocation8 + $0x80] sm:$0xff] }
 0x30d   :  { %2583 = vmatpush.bf16.msra.mxu2 %v5155_v30  ;;  %2754 = vmatpush.bf16.msrb.mxu0 %v5174_v41  ;;  %v5207_v30 = vld [vmem:[#allocation8 + $0x1a8] sm:$0xff]  ;;  %v5217_v41 = vld [vmem:[#allocation8 + $0x1f8] sm:$0xff] }
 0x311   :  { %2584 = vmatpush.bf16.msra.mxu2 %v5154_v33 }
 0x315   :  { %2838 = vmatpush.bf16.msrb.mxu2 %v5185_v43  ;;  %v5204_v43 = vld [vmem:[#allocation8 + $0x190] sm:$0xff] }
 0x319   :  { %v1814_v32 = vpop.f32.mrf.mxu2  ;;  %2839 = vmatpush.bf16.msrb.mxu2 %v5184_v46  ;;  %v5215_v46 = vld [vmem:[#allocation8 + $0x1e8] sm:$0xff] }
 0x31a   :  { %v1819_v57 = vadd.f32 %v1814_v32, %v1732_v53  ;;  %v5167_v32 = vld [vmem:[#allocation8 + $0x68] sm:$0xff]  ;;  %v5182_v53 = vld [vmem:[#allocation8 + $0xe0] sm:$0xff] }
 0x31b   :  { %2666 = vmatpush.bf16.msra.mxu3 %v5167_v32 }
 0x31d   :  { %2840 = vmatpush.bf16.msrb.mxu2 %v5183_v49 }
 0x31f   :  { %2667 = vmatpush.bf16.msra.mxu3 %v5166_v34 }
 0x321   :  { %v1816_v40 = vpop.f32.mrf.mxu2  ;;  %2841 = vmatpush.bf16.msrb.mxu2 %v5182_v53 }
 0x322   :  { %v1820_v58 = vadd.f32 %v1816_v40, %v1733_v55  ;;  %v5288_v40 = vld [vmem:[%s5818_s2 + $0x38] sm:$0xff] }
 0x323   :  { %2668 = vmatpush.bf16.msra.mxu3 %v5165_v35  ;;  %v5194_v35 = vld [vmem:[#allocation8 + $0x140] sm:$0xff] }
 0x327   :  { %2669 = vmatpush.bf16.msra.mxu3 %v5164_v36  ;;  %v5206_v36 = vld [vmem:[#allocation8 + $0x1a0] sm:$0xff] }
 0x329   :  { %v1901_v37 = vpop.f32.mrf.mxu3 }
 0x32a   :  { %v1906_v59 = vadd.f32 %v1901_v37, %v1819_v57  ;;  %v5163_v37 = vld [vmem:[#allocation8 + $0x48] sm:$0xff] }
 0x32b   :  { %2670 = vmatpush.bf16.msra.mxu3 %v5163_v37 }
 0x331   :  { %v1903_v44 = vpop.f32.mrf.mxu3 }
 0x332   :  { %v1907_v60 = vadd.f32 %v1903_v44, %v1820_v58  ;;  %v5181_v58 = vld [vmem:[#allocation8 + $0xd8] sm:$0xff] }
 0x333   :  { %v1988_v39 = vpop.f32.mrf.mxu1  ;;  %2842 = vmatpush.bf16.msrb.mxu2 %v5181_v58  ;;  %v5212_v58 = vld [vmem:[#allocation8 + $0x1d0] sm:$0xff] }
 0x334   :  { %v1993_v61 = vadd.f32 %v1988_v39, %v1906_v59  ;;  %v5162_v39 = vld [vmem:[#allocation8 + $0x40] sm:$0xff]  ;;  %v5193_v59 = vld [vmem:[#allocation8 + $0x138] sm:$0xff] }
 0x335   :  { %2671 = vmatpush.bf16.msra.mxu3 %v5162_v39  ;;  %v5205_v39 = vld [vmem:[#allocation8 + $0x198] sm:$0xff] }
 0x33b   :  { %v1990_v45 = vpop.f32.mrf.mxu1 }
 0x33c   :  { %v1994_v63 = vadd.f32 %v1990_v45, %v1907_v60  ;;  %v5172_v45 = vld [vmem:[#allocation8 + $0x90] sm:$0xff] }
 0x349   :  { %v2075_v42 = vpop.f32.mrf.mxu2 }
 0x34a   :  { %v2080_v0 = vadd.f32 %v2075_v42, %v1993_v61  ;;  %v5173_v42 = vld [vmem:[#allocation8 + $0x98] sm:$0xff]  ;;  %v5180_v61 = vld [vmem:[#allocation8 + $0xd0] sm:$0xff] }
 0x34b   :  { %2755 = vmatpush.bf16.msrb.mxu0 %v5173_v42  ;;  %2843 = vmatpush.bf16.msrb.mxu2 %v5180_v61  ;;  %v5223_v61 = vld [vmem:[#allocation8 + $0x228] sm:$0xff] }
 0x34f   :  { %2756 = vmatpush.bf16.msrb.mxu0 %v5172_v45  ;;  %v5203_v45 = vld [vmem:[#allocation8 + $0x188] sm:$0xff] }
 0x351   :  { %v2077_v51 = vpop.f32.mrf.mxu2 }
 0x352   :  { %v2081_v7 = vadd.f32 %v2077_v51, %v1994_v63  ;;  %v5290_v63 = vld [vmem:[%s5818_s2 + $0x48] sm:$0xff] }
 0x353   :  { %2757 = vmatpush.bf16.msrb.mxu0 %v5171_v48 }
 0x357   :  { %2758 = vmatpush.bf16.msrb.mxu0 %v5170_v52 }
 0x359   :  { %v2162_v56 = vpop.f32.mrf.mxu3 }
 0x35a   :  { %v2167_v2 = vadd.f32 %v2162_v56, %v2080_v0  ;;  %v5179_v0 = vld [vmem:[#allocation8 + $0xc8] sm:$0xff] }
 0x35b   :  { %2844 = vmatpush.bf16.msrb.mxu2 %v5179_v0 }
 0x361   :  { %v2164_v1 = vpop.f32.mrf.mxu3 }
 0x362   :  { %v2168_v4 = vadd.f32 %v2164_v1, %v2081_v7  ;;  %v5191_v1 = vld [vmem:[#allocation8 + $0x128] sm:$0xff] }
 0x363   :  { %v2249_v54 = vpop.f32.mrf.mxu1 }
 0x364   :  { %v2254_v8 = vadd.f32 %v2249_v54, %v2167_v2 }
 0x36b   :  { %v2251_v3 = vpop.f32.mrf.mxu1 }
 0x36c   :  { %v2255_v5 = vadd.f32 %v2251_v3, %v2168_v4  ;;  %v5178_v4 = vld [vmem:[#allocation8 + $0xc0] sm:$0xff] }
 0x36d   :  { %2845 = vmatpush.bf16.msrb.mxu2 %v5178_v4 }
 0x379   :  { %v2336_v62 = vpop.f32.mrf.mxu2 }
 0x37a   :  { %v2341_v10 = vadd.f32 %v2336_v62, %v2254_v8  ;;  %v5192_v62 = vld [vmem:[#allocation8 + $0x130] sm:$0xff]  ;;  %v5190_v8 = vld [vmem:[#allocation8 + $0x120] sm:$0xff] }
 0x37c   :  { %v2343_v9 = vmax.f32 %v2341_v10, 0.0 }
 0x381   :  { %v2338_v6 = vpop.f32.mrf.mxu2 }
 0x382   :  { %v2342_v11 = vadd.f32 %v2338_v6, %v2255_v5 }
 0x384   :  { %v2344_v12 = vmax.f32 %v2342_v11, 0.0  ;;  %v5189_v11 = vld [vmem:[#allocation8 + $0x118] sm:$0xff] }
 0x386   :  { %v2345_v13 = vpack.c.bf16 %v2344_v12, %v2343_v9  ;;  %v5201_v9 = vld [vmem:[#allocation8 + $0x178] sm:$0xff] }
 0x387   :  { %3012 = vmatpush.bf16.msra.mxu0 %v5201_v9  ;;  %v5219_v9 = vld [vmem:[#allocation8 + $0x208] sm:$0xff] }
 0x388   :  { %2422 = vmatmul.bf16.vlgmr.msrb.gmra.mxu3 %v2345_v13  ;;  %2435 = vmatpush.bf16.msra.mxu1 %v2345_v13  ;;  %v5188_v13 = vld [vmem:[#allocation8 + $0x110] sm:$0xff] }
 0x389   :  { %2925 = vmatpush.bf16.msrb.mxu3 %v5193_v59  ;;  %v5224_v59 = vld [vmem:[#allocation8 + $0x230] sm:$0xff] }
 0x38b   :  { %4499 = vmatmul.msk.bf16.vlgmr.msra.gmra.mxu1 %vm331_vm0, %v5281_v14  ;;  %v5200_v14 = vld [vmem:[#allocation8 + $0x170] sm:$0xff] }
 0x38c   :  { %3013 = vmatpush.bf16.msra.mxu0 %v5200_v14 }
 0x38d   :  { %2926 = vmatpush.bf16.msrb.mxu3 %v5192_v62 }
 0x391   :  { %2927 = vmatpush.bf16.msrb.mxu3 %v5191_v1  ;;  %v5210_v1 = vld [vmem:[#allocation8 + $0x1c0] sm:$0xff] }
 0x395   :  { %2928 = vmatpush.bf16.msrb.mxu3 %v5190_v8  ;;  %v5221_v8 = vld [vmem:[#allocation8 + $0x218] sm:$0xff] }
 0x399   :  { %2929 = vmatpush.bf16.msrb.mxu3 %v5189_v11  ;;  %v5232_v11 = vld [vmem:[#allocation8 + $0x270] sm:$0xff] }
 0x39b   :  { %4500 = vmatmul.msk.bf16.gmra.mxu1 %vm331_vm0, %v5282_v15  ;;  %v5187_v15 = vld [vmem:[#allocation8 + $0x108] sm:$0xff] }
 0x39d   :  { %2930 = vmatpush.bf16.msrb.mxu3 %v5188_v13 }
 0x3a1   :  { %2931 = vmatpush.bf16.msrb.mxu3 %v5187_v15 }
 0x3a5   :  { %2932 = vmatpush.bf16.msrb.mxu3 %v5186_v20 }
 0x3ab   :  { %4501 = vmatmul.msk.bf16.gmra.mxu1 %vm331_vm0, %v5283_v18  ;;  %v5199_v18 = vld [vmem:[#allocation8 + $0x168] sm:$0xff] }
 0x3ac   :  { %3014 = vmatpush.bf16.msra.mxu0 %v5199_v18  ;;  %v5218_v18 = vld [vmem:[#allocation8 + $0x200] sm:$0xff] }
 0x3b0   :  { %3015 = vmatpush.bf16.msra.mxu0 %v5198_v21  ;;  %v5229_v21 = vld [vmem:[#allocation8 + $0x258] sm:$0xff] }
 0x3b4   :  { %3016 = vmatpush.bf16.msra.mxu0 %v5197_v31 }
 0x3b8   :  { %3017 = vmatpush.bf16.msra.mxu0 %v5196_v27  ;;  %v5226_v27 = vld [vmem:[#allocation8 + $0x240] sm:$0xff] }
 0x3bb   :  { %4502 = vmatmul.msk.bf16.gmra.mxu1 %vm331_vm0, %v5284_v16 }
 0x3bc   :  { %3018 = vmatpush.bf16.msra.mxu0 %v5195_v29 }
 0x3c0   :  { %3019 = vmatpush.bf16.msra.mxu0 %v5194_v35 }
 0x3cb   :  { %4503 = vmatmul.msk.bf16.gmra.mxu1 %vm331_vm0, %v5285_v17 }
 0x3db   :  { %4504 = vmatmul.msk.bf16.gmra.mxu1 %vm331_vm0, %v5286_v22 }
 0x3eb   :  { %4505 = vmatmul.msk.bf16.gmra.mxu1 %vm331_vm0, %v5287_v28  ;;  %v5208_v28 = vld [vmem:[#allocation8 + $0x1b0] sm:$0xff] }
 0x3fb   :  { %4506 = vmatmul.msk.bf16.gmra.mxu1 %vm331_vm0, %v5288_v40 }
 0x408   :  { %v2437_v44 = vpop.f32.mrf.mxu1 }
 0x409   :  { %v2487_v50 = vpack.c.bf16 %v2437_v44, %v2437_v44  ;;  %v5216_v44 = vld [vmem:[#allocation8 + $0x1f0] sm:$0xff] }
 0x40b   :  { %4507 = vmatmul.msk.bf16.gmra.mxu1 %vm331_vm0, %v5289_v47  ;;  %v2525_v54 = vunpack.c.l.b16 %v2487_v50  ;;  %v5202_v50 = vld [vmem:[#allocation8 + $0x180] sm:$0xff] }
 0x410   :  { %v2439_v51 = vpop.f32.mrf.mxu1 }
 0x411   :  { %v2488_v56 = vpack.c.bf16 %v2439_v51, %v2439_v51  ;;  %v5214_v51 = vld [vmem:[#allocation8 + $0x1e0] sm:$0xff] }
 0x413   :  { %v2526_v55 = vunpack.c.l.b16 %v2488_v56 }
 0x415   :  { %v2527_v57 = vpack.c.b16 %v2526_v55, %v2525_v54  ;;  %v5213_v54 = vld [vmem:[#allocation8 + $0x1d8] sm:$0xff] }
 0x416   :  { %v5225_v55 = vld [vmem:[#allocation8 + $0x238] sm:$0xff] }
 0x417   :  { %2585 = vmatmul.bf16.vlgmr.msra.gmra.mxu2 %v2527_v57 }
 0x418   :  { %v2442_v60 = vpop.f32.mrf.mxu1  ;;  %3099 = vmatpush.bf16.msra.mxu2 %v5209_v25 }
 0x419   :  { %v2489_v7 = vpack.c.bf16 %v2442_v60, %v2442_v60  ;;  %v5211_v60 = vld [vmem:[#allocation8 + $0x1c8] sm:$0xff] }
 0x41b   :  { %4508 = vmatmul.msk.bf16.gmra.mxu1 %vm331_vm0, %v5290_v63  ;;  %v2612_v5 = vunpack.c.l.b16 %v2489_v7  ;;  %v5222_v7 = vld [vmem:[#allocation8 + $0x220] sm:$0xff] }
 0x41c   :  { %3100 = vmatpush.bf16.msra.mxu2 %v5208_v28 }
 0x420   :  { %v2444_v2 = vpop.f32.mrf.mxu1  ;;  %3101 = vmatpush.bf16.msra.mxu2 %v5207_v30 }
 0x421   :  { %v2490_v3 = vpack.c.bf16 %v2444_v2, %v2444_v2 }
 0x423   :  { %v2613_v10 = vunpack.c.l.b16 %v2490_v3 }
 0x424   :  { %3102 = vmatpush.bf16.msra.mxu2 %v5206_v36 }
 0x425   :  { %v2614_v6 = vpack.c.b16 %v2613_v10, %v2612_v5  ;;  %v5233_v5 = vld [vmem:[#allocation8 + $0x278] sm:$0xff] }
 0x427   :  { %2672 = vmatmul.bf16.vlgmr.msra.gmra.mxu3 %v2614_v6  ;;  %v5220_v6 = vld [vmem:[#allocation8 + $0x210] sm:$0xff] }
 0x428   :  { %v2447_v12 = vpop.f32.mrf.mxu1  ;;  %3103 = vmatpush.bf16.msra.mxu2 %v5205_v39  ;;  %3186 = vmatpush.bf16.msra.mxu3 %v5217_v41 }
 0x429   :  { %v2491_v16 = vpack.c.bf16 %v2447_v12, %v2447_v12  ;;  %v5231_v12 = vld [vmem:[#allocation8 + $0x268] sm:$0xff] }
 0x42b   :  { %v2699_v22 = vunpack.c.l.b16 %v2491_v16  ;;  %v5230_v16 = vld [vmem:[#allocation8 + $0x260] sm:$0xff] }
 0x42c   :  { %3104 = vmatpush.bf16.msra.mxu2 %v5204_v43  ;;  %3187 = vmatpush.bf16.msra.mxu3 %v5216_v44 }
 0x430   :  { %v2449_v17 = vpop.f32.mrf.mxu1  ;;  %3105 = vmatpush.bf16.msra.mxu2 %v5203_v45  ;;  %3188 = vmatpush.bf16.msra.mxu3 %v5215_v46  ;;  %v2423_v46 = vpop.f32.mrf.mxu3 }
 0x431   :  { %v2492_v19 = vpack.c.bf16 %v2449_v17, %v2449_v17 }
 0x433   :  { %v2700_v23 = vunpack.c.l.b16 %v2492_v19 }
 0x434   :  { %3106 = vmatpush.bf16.msra.mxu2 %v5202_v50  ;;  %3189 = vmatpush.bf16.msra.mxu3 %v5214_v51 }
 0x435   :  { %v2701_v24 = vpack.c.b16 %v2700_v23, %v2699_v22  ;;  %v5228_v23 = vld [vmem:[#allocation8 + $0x250] sm:$0xff] }
 0x437   :  { %2759 = vmatmul.bf16.vlgmr.msrb.gmra.mxu0 %v2701_v24  ;;  %v5227_v24 = vld [vmem:[#allocation8 + $0x248] sm:$0xff] }
 0x438   :  { %v2452_v26 = vpop.f32.mrf.mxu1  ;;  %3190 = vmatpush.bf16.msra.mxu3 %v5213_v54  ;;  %3273 = vmatpush.bf16.msrb.mxu0 %v5225_v55 }
 0x439   :  { %v2493_v32 = vpack.c.bf16 %v2452_v26, %v2452_v26 }
 0x43b   :  { %v2786_v40 = vunpack.c.l.b16 %v2493_v32 }
 0x43c   :  { %3191 = vmatpush.bf16.msra.mxu3 %v5212_v58  ;;  %3274 = vmatpush.bf16.msrb.mxu0 %v5224_v59  ;;  %v5264_v58 = vld [vmem:[#allocation13 + $0x74] sm:$0xf]  ;;  %v4891_v59 = vld [vmem:[#allocation13 + $0x78] sm:$0xf0] }
 0x440   :  { %v2454_v33 = vpop.f32.mrf.mxu1  ;;  %3192 = vmatpush.bf16.msra.mxu3 %v5211_v60  ;;  %3275 = vmatpush.bf16.msrb.mxu0 %v5223_v61  ;;  %v4894_v60 = vor.u32 %v5264_v58, %v4891_v59  ;;  %v5238_v59 = vld [vmem:[#allocation11 + $0x24] sm:$0xf] }
 0x441   :  { %v2494_v34 = vpack.c.bf16 %v2454_v33, %v2454_v33 }
 0x442   :  { %3538 = vmatpush.bf16.msrb.mxu1 %v4894_v60  ;;  %v4915_v60 = vld [vmem:[#allocation11 + $0x28] sm:$0xf0] }
 0x443   :  { %v2787_v37 = vunpack.c.l.b16 %v2494_v34 }
 0x444   :  { %3193 = vmatpush.bf16.msra.mxu3 %v5210_v1  ;;  %3276 = vmatpush.bf16.msrb.mxu0 %v5222_v7  ;;  %v5260_v1 = vld [vmem:[#allocation13 + $0x54] sm:$0xf]  ;;  %v5279_v7 = vld [vmem:[%s5807_s12] ss:$0 sm:$0xff] }
 0x445   :  { %v2788_v38 = vpack.c.b16 %v2787_v37, %v2786_v40 }
 0x447   :  { %2846 = vmatmul.bf16.vlgmr.msrb.gmra.mxu2 %v2788_v38 }
 0x448   :  { %v2457_v42 = vpop.f32.mrf.mxu1  ;;  %3277 = vmatpush.bf16.msrb.mxu0 %v5221_v8  ;;  %3360 = vmatpush.bf16.msrb.mxu2 %v5233_v5  ;;  %v5258_v5 = vld [vmem:[#allocation13 + $0x44] sm:$0xf] }
 0x449   :  { %v2495_v47 = vpack.c.bf16 %v2457_v42, %v2457_v42 }
 0x44b   :  { %v2873_v56 = vunpack.c.l.b16 %v2495_v47 }
 0x44c   :  { %3278 = vmatpush.bf16.msrb.mxu0 %v5220_v6  ;;  %3361 = vmatpush.bf16.msrb.mxu2 %v5232_v11  ;;  %v5248_v6 = vld [vmem:[#allocation11 + $0x74] sm:$0xf]  ;;  %v2424_v11 = vadd.f32 %v5279_v7, %v2423_v46 }
 0x450   :  { %v2459_v48 = vpop.f32.mrf.mxu1  ;;  %3279 = vmatpush.bf16.msrb.mxu0 %v5219_v9  ;;  %3362 = vmatpush.bf16.msrb.mxu2 %v5231_v12  ;;  %v4955_v12 = vld [vmem:[#allocation11 + $0x78] sm:$0xf0] }
 0x451   :  { %v2496_v49 = vpack.c.bf16 %v2459_v48, %v2459_v48  ;;  %v2425_v48 = vpop.f32.mrf.mxu3 }
 0x452   :  { %v2426_v9 = vadd.f32 %v5279_v7, %v2425_v48  ;;  %v5240_v48 = vld [vmem:[#allocation11 + $0x34] sm:$0xf]  ;;  %v5249_v7 = vld [vmem:[#allocation11 + $0x74] sm:$0xf0] }
 0x453   :  { %v2874_v52 = vunpack.c.l.b16 %v2496_v49 }
 0x454   :  { %3280 = vmatpush.bf16.msrb.mxu0 %v5218_v18  ;;  %3363 = vmatpush.bf16.msrb.mxu2 %v5230_v16 }
 0x455   :  { %v2875_v53 = vpack.c.b16 %v2874_v52, %v2873_v56 }
 0x457   :  { %2933 = vmatmul.bf16.vlgmr.msrb.gmra.mxu3 %v2875_v53 }
 0x458   :  { %v2462_v57 = vpop.f32.mrf.mxu1  ;;  %3364 = vmatpush.bf16.msrb.mxu2 %v5229_v21  ;;  %v5256_v21 = vld [vmem:[#allocation13 + $0x34] sm:$0xf] }
 0x459   :  { %v2497_v62 = vpack.c.bf16 %v2462_v57, %v2462_v57 }
 0x45b   :  { %v2960_v2 = vunpack.c.l.b16 %v2497_v62 }
 0x45c   :  { %3365 = vmatpush.bf16.msrb.mxu2 %v5228_v23 }
 0x460   :  { %v2464_v63 = vpop.f32.mrf.mxu1  ;;  %3366 = vmatpush.bf16.msrb.mxu2 %v5227_v24 }
 0x461   :  { %v2498_v0 = vpack.c.bf16 %v2464_v63, %v2464_v63  ;;  %v5262_v63 = vld [vmem:[#allocation13 + $0x64] sm:$0xf] }
 0x463   :  { %v2961_v3 = vunpack.c.l.b16 %v2498_v0  ;;  %v4883_v0 = vld [vmem:[#allocation13 + $0x68] sm:$0xf0] }
 0x464   :  { %3367 = vmatpush.bf16.msrb.mxu2 %v5226_v27 }
 0x465   :  { %v2962_v4 = vpack.c.b16 %v2961_v3, %v2960_v2  ;;  %v4886_v2 = vor.u32 %v5262_v63, %v4883_v0  ;;  %v4875_v3 = vld [vmem:[#allocation13 + $0x58] sm:$0xf0]  ;;  %v5265_v63 = vld [vmem:[#allocation13 + $0x74] sm:$0xf0]  ;;  %v4953_v0 = vld [vmem:[#allocation11 + $0x70] sm:$0xf] }
 0x466   :  { %v4878_v8 = vor.u32 %v5260_v1, %v4875_v3  ;;  %v4835_v3 = vld [vmem:[#allocation13 + $0x8] sm:$0xf0] }
 0x467   :  { %3020 = vmatmul.bf16.vlgmr.msra.gmra.mxu0 %v2962_v4  ;;  %3539 = vmatpush.bf16.msrb.mxu1 %v4886_v2  ;;  %v5250_v2 = vld [vmem:[#allocation13 + $0x4] sm:$0xf] }
 0x468   :  { %v2467_v10 = vpop.f32.mrf.mxu1 }
 0x469   :  { %v2499_v13 = vpack.c.bf16 %v2467_v10, %v2467_v10  ;;  %v4867_v10 = vld [vmem:[#allocation13 + $0x48] sm:$0xf0] }
 0x46a   :  { %v4870_v16 = vor.u32 %v5258_v5, %v4867_v10 }
 0x46b   :  { %v3047_v17 = vunpack.c.l.b16 %v2499_v13  ;;  %v4958_v13 = vor.u32 %v5248_v6, %v4955_v12  ;;  %3540 = vmatpush.bf16.msrb.mxu1 %v4878_v8  ;;  %v4838_v8 = vor.u32 %v5250_v2, %v4835_v3  ;;  %v5236_v12 = vld [vmem:[#allocation11 + $0x14] sm:$0xf] }
 0x46f   :  { %3541 = vmatpush.bf16.msrb.mxu1 %v4870_v16  ;;  %v5247_v16 = vld [vmem:[#allocation11 + $0x64] sm:$0xf0] }
 0x470   :  { %v2469_v14 = vpop.f32.mrf.mxu1 }
 0x471   :  { %v2500_v15 = vpack.c.bf16 %v2469_v14, %v2469_v14  ;;  %v5246_v14 = vld [vmem:[#allocation11 + $0x64] sm:$0xf] }
 0x473   :  { %v3048_v19 = vunpack.c.l.b16 %v2500_v15 }
 0x475   :  { %v3049_v20 = vpack.c.b16 %v3048_v19, %v3047_v17  ;;  %v4947_v17 = vld [vmem:[#allocation11 + $0x68] sm:$0xf0] }
 0x476   :  { %v4950_v23 = vor.u32 %v5246_v14, %v4947_v17  ;;  %v3377_v17 = vld [vmem:[%s5819_s25] sm:$0x1] }
 0x477   :  { %3107 = vmatmul.bf16.vlgmr.msra.gmra.mxu2 %v3049_v20 }
 0x478   :  { %v2472_v22 = vpop.f32.mrf.mxu1  ;;  %3644 = vmatpush.bf16.msra.mxu2 %v4958_v13  ;;  %v4907_v13 = vld [vmem:[#allocation11 + $0x18] sm:$0xf0] }
 0x479   :  { %v2501_v31 = vpack.c.bf16 %v2472_v22, %v2472_v22  ;;  %v4859_v22 = vld [vmem:[#allocation13 + $0x38] sm:$0xf0] }
 0x47b   :  { %v3134_v28 = vunpack.c.l.b16 %v2501_v31 }
 0x47c   :  { %3645 = vmatpush.bf16.msra.mxu2 %v4950_v23  ;;  %v4873_v23 = vld [vmem:[#allocation13 + $0x50] sm:$0xf] }
 0x480   :  { %v2474_v25 = vpop.f32.mrf.mxu1 }
 0x481   :  { %v2502_v26 = vpack.c.bf16 %v2474_v25, %v2474_v25  ;;  %v5244_v25 = vld [vmem:[#allocation11 + $0x54] sm:$0xf] }
 0x483   :  { %v3135_v29 = vunpack.c.l.b16 %v2502_v26  ;;  %v4939_v26 = vld [vmem:[#allocation11 + $0x58] sm:$0xf0] }
 0x485   :  { %v3136_v30 = vpack.c.b16 %v3135_v29, %v3134_v28 }
 0x487   :  { %3194 = vmatmul.bf16.vlgmr.msra.gmra.mxu3 %v3136_v30  ;;  %v4862_v30 = vor.u32 %v5256_v21, %v4859_v22 }
 0x488   :  { %v2477_v32 = vpop.f32.mrf.mxu1 }
 0x489   :  { %v2503_v33 = vpack.c.bf16 %v2477_v32, %v2477_v32  ;;  %v5254_v32 = vld [vmem:[#allocation13 + $0x24] sm:$0xf]  ;;  %3542 = vmatpush.bf16.msrb.mxu1 %v4862_v30  ;;  %v4929_v30 = vld [vmem:[#allocation11 + $0x40] sm:$0xf] }
 0x48b   :  { %v3221_v36 = vunpack.c.l.b16 %v2503_v33  ;;  %v4851_v33 = vld [vmem:[#allocation13 + $0x28] sm:$0xf0] }
 0x490   :  { %v2479_v34 = vpop.f32.mrf.mxu1 }
 0x491   :  { %v2504_v35 = vpack.c.bf16 %v2479_v34, %v2479_v34  ;;  %v4942_v34 = vor.u32 %v5244_v25, %v4939_v26  ;;  %v5245_v25 = vld [vmem:[#allocation11 + $0x54] sm:$0xf0] }
 0x493   :  { %v3222_v40 = vunpack.c.l.b16 %v2504_v35  ;;  %3646 = vmatpush.bf16.msra.mxu2 %v4942_v34 }
 0x495   :  { %v3223_v37 = vpack.c.b16 %v3222_v40, %v3221_v36  ;;  %v5242_v40 = vld [vmem:[#allocation11 + $0x44] sm:$0xf] }
 0x497   :  { %3281 = vmatmul.bf16.vlgmr.msrb.gmra.mxu0 %v3223_v37  ;;  %v4931_v37 = vld [vmem:[#allocation11 + $0x48] sm:$0xf0] }
 0x498   :  { %v2482_v38 = vpop.f32.mrf.mxu1 }
 0x499   :  { %v2505_v39 = vpack.c.bf16 %v2482_v38, %v2482_v38 }
 0x49a   :  { %v2586_v47 = vpop.f32.mrf.mxu2 }
 0x49b   :  { %v3308_v43 = vunpack.c.l.b16 %v2505_v39  ;;  %v2591_v15 = vadd.f32 %v2586_v47, %v2424_v11  ;;  %v4954_v11 = vor.u32 %v5249_v7, %v4953_v0 }
 0x4a0   :  { %v2484_v41 = vpop.f32.mrf.mxu1 }
 0x4a1   :  { %v2506_v42 = vpack.c.bf16 %v2484_v41, %v2484_v41  ;;  %v4854_v41 = vor.u32 %v5254_v32, %v4851_v33  ;;  %v5243_v32 = vld [vmem:[#allocation11 + $0x44] sm:$0xf0] }
 0x4a2   :  { %v2588_v49 = vpop.f32.mrf.mxu2  ;;  %v4930_v34 = vor.u32 %v5243_v32, %v4929_v30  ;;  %v5280_v32 = vld [vmem:[#allocation2] ss:$0 sm:$0xff] }
 0x4a3   :  { %v3309_v44 = vunpack.c.l.b16 %v2506_v42  ;;  %v2592_v18 = vadd.f32 %v2588_v49, %v2426_v9  ;;  %v4923_v49 = vld [vmem:[#allocation11 + $0x38] sm:$0xf0]  ;;  %3543 = vmatpush.bf16.msrb.mxu1 %v4854_v41  ;;  %v4881_v9 = vld [vmem:[#allocation13 + $0x60] sm:$0xf] }
 0x4a4   :  { %v4849_v41 = vld [vmem:[#allocation13 + $0x20] sm:$0xf] }
 0x4a5   :  { %v3310_v45 = vpack.c.b16 %v3309_v44, %v3308_v43  ;;  %v5252_v43 = vld [vmem:[#allocation13 + $0x14] sm:$0xf]  ;;  %v4843_v44 = vld [vmem:[#allocation13 + $0x18] sm:$0xf0] }
 0x4a7   :  { %3368 = vmatmul.bf16.vlgmr.msrb.gmra.mxu2 %v3310_v45  ;;  %v4934_v45 = vor.u32 %v5242_v40, %v4931_v37  ;;  %v4921_v40 = vld [vmem:[#allocation11 + $0x30] sm:$0xf]  ;;  %v5241_v37 = vld [vmem:[#allocation11 + $0x34] sm:$0xf0] }
 0x4a9   :  { %3647 = vmatpush.bf16.msra.mxu2 %v4934_v45 }
 0x4aa   :  { %v2673_v50 = vpop.f32.mrf.mxu3 }
 0x4ab   :  { %v2678_v24 = vadd.f32 %v2673_v50, %v2591_v15  ;;  %v5263_v15 = vld [vmem:[#allocation13 + $0x64] sm:$0xf0] }
 0x4ac   :  { %v4882_v21 = vor.u32 %v5263_v15, %v4881_v9 }
 0x4b2   :  { %v2675_v52 = vpop.f32.mrf.mxu3 }
 0x4b3   :  { %v2679_v31 = vadd.f32 %v2675_v52, %v2592_v18  ;;  %v4945_v18 = vld [vmem:[#allocation11 + $0x60] sm:$0xf] }
 0x4b4   :  { %v2760_v51 = vpop.f32.mrf.mxu0  ;;  %v4946_v22 = vor.u32 %v5247_v16, %v4945_v18 }
 0x4b5   :  { %v2765_v28 = vadd.f32 %v2760_v51, %v2678_v24  ;;  %v5261_v24 = vld [vmem:[#allocation13 + $0x54] sm:$0xf0] }
 0x4b6   :  { %v4874_v26 = vor.u32 %v5261_v24, %v4873_v23 }
 0x4bc   :  { %v2762_v53 = vpop.f32.mrf.mxu0 }
 0x4bd   :  { %v2766_v29 = vadd.f32 %v2762_v53, %v2679_v31  ;;  %v4937_v31 = vld [vmem:[#allocation11 + $0x50] sm:$0xf] }
 0x4ca   :  { %v2847_v56 = vpop.f32.mrf.mxu2 }
 0x4cb   :  { %v2852_v35 = vadd.f32 %v2847_v56, %v2765_v28  ;;  %v4846_v56 = vor.u32 %v5252_v43, %v4843_v44  ;;  %v4865_v28 = vld [vmem:[#allocation13 + $0x40] sm:$0xf]  ;;  %v5239_v44 = vld [vmem:[#allocation11 + $0x24] sm:$0xf0] }
 0x4cc   :  { %v4913_v43 = vld [vmem:[#allocation11 + $0x20] sm:$0xf] }
 0x4cd   :  { %3544 = vmatpush.bf16.msrb.mxu1 %v4846_v56  ;;  %v4833_v56 = vld [vmem:[#allocation13] sm:$0xf] }
 0x4d1   :  { %3545 = vmatpush.bf16.msrb.mxu1 %v4838_v8  ;;  %v3667_v8 = vld [vmem:[%s5811_s16] sm:$0x3] }
 0x4d2   :  { %v2849_v54 = vpop.f32.mrf.mxu2 }
 0x4d3   :  { %v2853_v36 = vadd.f32 %v2849_v54, %v2766_v29  ;;  %v4926_v54 = vor.u32 %v5240_v48, %v4923_v49  ;;  %v5259_v29 = vld [vmem:[#allocation13 + $0x44] sm:$0xf0]  ;;  %v5253_v48 = vld [vmem:[#allocation13 + $0x14] sm:$0xf0]  ;;  %v4905_v49 = vld [vmem:[#allocation11 + $0x10] sm:$0xf] }
 0x4d4   :  { %v4866_v33 = vor.u32 %v5259_v29, %v4865_v28 }
 0x4d5   :  { %3648 = vmatpush.bf16.msra.mxu2 %v4926_v54 }
 0x4da   :  { %v2934_v55 = vpop.f32.mrf.mxu3 }
 0x4db   :  { %v2939_v38 = vadd.f32 %v2934_v55, %v2852_v35  ;;  %v4857_v35 = vld [vmem:[#allocation13 + $0x30] sm:$0xf] }
 0x4e2   :  { %v2936_v62 = vpop.f32.mrf.mxu3 }
 0x4e3   :  { %v2940_v39 = vadd.f32 %v2936_v62, %v2853_v36  ;;  %v4889_v62 = vld [vmem:[#allocation13 + $0x70] sm:$0xf]  ;;  %v5257_v36 = vld [vmem:[#allocation13 + $0x34] sm:$0xf0] }
 0x4e4   :  { %v3021_v57 = vpop.f32.mrf.mxu0  ;;  %v4890_v6 = vor.u32 %v5265_v63, %v4889_v62  ;;  %v4899_v62 = vld [vmem:[#allocation11 + $0x8] sm:$0xf0] }
 0x4e5   :  { %v3026_v46 = vadd.f32 %v3021_v57, %v2939_v38  ;;  %v4858_v38 = vor.u32 %v5257_v36, %v4857_v35 }
 0x4ec   :  { %v3023_v4 = vpop.f32.mrf.mxu0 }
 0x4ed   :  { %v3027_v47 = vadd.f32 %v3023_v4, %v2940_v39  ;;  %v4918_v4 = vor.u32 %v5238_v59, %v4915_v60  ;;  %v4922_v39 = vor.u32 %v5241_v37, %v4921_v40  ;;  %v5234_v59 = vld [vmem:[#allocation11 + $0x4] sm:$0xf] }
 0x4ee   :  { %v4902_v63 = vor.u32 %v5234_v59, %v4899_v62 }
 0x4ef   :  { %3649 = vmatpush.bf16.msra.mxu2 %v4918_v4  ;;  %v3657_v4 = vld [vmem:[%s5810_s15] sm:$0x3] }
 0x4f0   :  { %v3660_v15 = vperm.slane %v3657_v4, 1 }
 0x4fa   :  { %v3108_v61 = vpop.f32.mrf.mxu2 }
 0x4fb   :  { %v3113_v51 = vadd.f32 %v3108_v61, %v3026_v46  ;;  %v4914_v46 = vor.u32 %v5239_v44, %v4913_v43 }
 0x502   :  { %v3110_v19 = vpop.f32.mrf.mxu2 }
 0x503   :  { %v3114_v52 = vadd.f32 %v3110_v19, %v3027_v47  ;;  %v3395_v19 = vld [vmem:[%s5820_s7] sm:$0x1]  ;;  %v4841_v47 = vld [vmem:[#allocation13 + $0x10] sm:$0xf] }
 0x50a   :  { %v3195_v20 = vpop.f32.mrf.mxu3 }
 0x50b   :  { %v3200_v55 = vadd.f32 %v3195_v20, %v3113_v51  ;;  %v4910_v20 = vor.u32 %v5236_v12, %v4907_v13  ;;  %v4842_v51 = vor.u32 %v5253_v48, %v4841_v47 }
 0x50d   :  { %3650 = vmatpush.bf16.msra.mxu2 %v4910_v20 }
 0x511   :  { %3651 = vmatpush.bf16.msra.mxu2 %v4902_v63 }
 0x512   :  { %v3197_v50 = vpop.f32.mrf.mxu3 }
 0x513   :  { %v3201_v58 = vadd.f32 %v3197_v50, %v3114_v52  ;;  %v5237_v50 = vld [vmem:[#allocation11 + $0x14] sm:$0xf0] }
 0x514   :  { %v3282_v27 = vpop.f32.mrf.mxu0  ;;  %v4906_v52 = vor.u32 %v5237_v50, %v4905_v49 }
 0x515   :  { %v3287_v1 = vadd.f32 %v3282_v27, %v3200_v55  ;;  %v4938_v27 = vor.u32 %v5245_v25, %v4937_v31  ;;  %v4897_v55 = vld [vmem:[#allocation11] sm:$0xf] }
 0x51c   :  { %v3284_v53 = vpop.f32.mrf.mxu0 }
 0x51d   :  { %v3288_v57 = vadd.f32 %v3284_v53, %v3201_v58  ;;  %v5251_v53 = vld [vmem:[#allocation13 + $0x4] sm:$0xf0] }
 0x51e   :  { %v4834_v54 = vor.u32 %v5251_v53, %v4833_v56  ;;  %v5235_v58 = vld [vmem:[#allocation11 + $0x4] sm:$0xf0] }
 0x51f   :  { %v4898_v60 = vor.u32 %v5235_v58, %v4897_v55 }
 0x52a   :  { %v3369_v42 = vpop.f32.mrf.mxu2 }
 0x52b   :  { %v3374_v5 = vadd.f32 %v3369_v42, %v3287_v1  ;;  %v5255_v42 = vld [vmem:[#allocation13 + $0x24] sm:$0xf0] }
 0x52c   :  { %v4850_v45 = vor.u32 %v5255_v42, %v4849_v41 }
 0x532   :  { %v3371_v61 = vpop.f32.mrf.mxu2 }
 0x533   :  { %v3375_v10 = vadd.f32 %v3371_v61, %v3288_v57 }
 0x535   :  { %v3376_v14 = vpack.c.bf16 %v3375_v10, %v3374_v5  ;;  %v3659_v5 = vperm.slane %v3657_v4, 0  ;;  %v3668_v10 = vunpack.c.l.bf16 %v3667_v8 }
 0x537   :  { %3388 = vmatpush.bf16.msrb.mxu3 %v3376_v14  ;;  %3406 = vmatpush.bf16.msra.mxu0 %v3376_v14  ;;  %v3670_v14 = vperm.slane %v3668_v10, 0  ;;  %v3671_v18 = vperm.slane %v3668_v10, 2 }
 0x539   :  { %v3674_v20 = vperm.slane %v3670_v14, 0  ;;  %v3675_v24 = vperm.slane %v3671_v18, 0 }
 0x53a   :  { %4829 = vmatmul.msk.bf16.vlgmr.msrb.gmra.mxu3 %vm331_vm0, %v3377_v17  ;;  %4830 = vmatmul.msk.bf16.vlgmr.msra.gmra.mxu0 %vm331_vm0, %v3395_v19 }
 0x53b   :  { %3525 = vmatpush.bf16.msra.mxu3 %v4890_v6  ;;  %3631 = vmatpush.bf16.msrb.mxu0 %v4954_v11 }
 0x53f   :  { %3526 = vmatpush.bf16.msra.mxu3 %v4882_v21  ;;  %3632 = vmatpush.bf16.msrb.mxu0 %v4946_v22 }
 0x543   :  { %3527 = vmatpush.bf16.msra.mxu3 %v4874_v26  ;;  %3633 = vmatpush.bf16.msrb.mxu0 %v4938_v27 }
 0x547   :  { %3528 = vmatpush.bf16.msra.mxu3 %v4866_v33  ;;  %3634 = vmatpush.bf16.msrb.mxu0 %v4930_v34 }
 0x54b   :  { %3529 = vmatpush.bf16.msra.mxu3 %v4858_v38  ;;  %3635 = vmatpush.bf16.msrb.mxu0 %v4922_v39 }
 0x54f   :  { %3530 = vmatpush.bf16.msra.mxu3 %v4850_v45  ;;  %3636 = vmatpush.bf16.msrb.mxu0 %v4914_v46 }
 0x553   :  { %3531 = vmatpush.bf16.msra.mxu3 %v4842_v51  ;;  %3637 = vmatpush.bf16.msrb.mxu0 %v4906_v52 }
 0x557   :  { %3532 = vmatpush.bf16.msra.mxu3 %v4834_v54  ;;  %3638 = vmatpush.bf16.msrb.mxu0 %v4898_v60 }
 0x5b7   :  { %v3408_v0 = vpop.f32.mrf.mxu0 }
 0x5b8   :  { %v3412_v1 = vpack.c.bf16 %v3408_v0, %v3408_v0 }
 0x5ba   :  { %3533 = vmatmul.bf16.vlgmr.msra.gmra.mxu3 %v3412_v1  ;;  %3546 = vmatmul.bf16.vlgmr.msrb.gmra.mxu1 %v3412_v1 }
 0x5bd   :  { %v3390_v57 = vpop.f32.mrf.mxu3 }
 0x5be   :  { %v3394_v7 = vpack.c.bf16 %v3390_v57, %v3390_v57 }
 0x5bf   :  { %v3410_v2 = vpop.f32.mrf.mxu0 }
 0x5c0   :  { %3639 = vmatmul.bf16.vlgmr.msrb.gmra.mxu0 %v3394_v7  ;;  %3652 = vmatmul.bf16.vlgmr.msra.gmra.mxu2 %v3394_v7 }
 0x5c5   :  { %v3392_v3 = vpop.f32.mrf.mxu3 }
 0x637   :  { %v3547_v61 = vpop.f32.mrf.mxu1 }
 0x63d   :  { %v3640_v6 = vpop.f32.mrf.mxu0  ;;  %v3534_v11 = vpop.f32.mrf.mxu3 }
 0x63e   :  { %v3641_v9 = vadd.f32 %v3640_v6, %v3534_v11 }
 0x63f   :  { %v3549_v12 = vpop.f32.mrf.mxu1 }
 0x640   :  { %v3663_v13 = vadd.f32 %v3659_v5, %v3641_v9 }
 0x642   :  { %v3665_v17 = vmax.f32 %v3663_v13, 0.0 }
 0x643   :  { %v3653_v16 = vpop.f32.mrf.mxu2 }
 0x644   :  { %v3654_v19 = vadd.f32 %v3653_v16, %v3547_v61  ;;  %v3676_v25 = vmul.f32 %v3674_v20, %v3665_v17 }
 0x645   :  { %v3642_v21 = vpop.f32.mrf.mxu0  ;;  %v3536_v22 = vpop.f32.mrf.mxu3 }
 0x646   :  { %v3664_v23 = vadd.f32 %v3660_v15, %v3654_v19  ;;  %v3679_v28 = vsel %vm3678_vm1, %v3676_v25, 0.0 }
 0x648   :  { %v3666_v31 = vmax.f32 %v3664_v23, 0.0 }
 0x64a   :  { %v3677_v26 = vmul.f32 %v3675_v24, %v3666_v31 }
 0x64b   :  { %v3655_v27 = vpop.f32.mrf.mxu2 }
 0x64c   :  { %v3680_v29 = vsel %vm3678_vm1, %v3677_v26, 0.0 }
 0x64d   :  { %v3681_v30 = vadd.f32 %v3680_v29, %v3679_v28 }
 0x64f   :  { %3682 = vadd.xlane.f32.xlu0 %v3681_v30 }
 0x6c2   :  { %v3683_v33 = vpop.xlane.xlu0 %3682 }
 0x6c3   :  { %v3688_v34 = vadd.f32 %v5280_v32, %v3683_v33 }
 0x6c5   :  { %3690 = vst.msk [vmem:[%s5813_s18] sm:$0x3] %vm3689_vm2, %v3688_v34 }
 0x6c6   :  { %3695 = vsyncpa [#allocation4], 1 }
 0x6c7   :  { %3696 = vsyncpa [#allocation6], 1 }
 0x6c8   :  { %3697 = vsyncpa [#allocation9], 1 }
 0x6c9   :  { %3698 = vsyncpa [#allocation12], 1 }

</bundles_post_ra>
